<compile_context>
chip_gen: v7x
topology: tpu7x:2x2x1
jax: 0.10.0
libtpu: 0.0.40
codegen_flags: <defaults>
</compile_context>

<pallas_src>
import functools
import math

import jax
import jax.numpy as jnp
from jax.experimental import pallas as pl
from jax.experimental.pallas import tpu as pltpu


# Tile targets (used when the problem is large enough; otherwise fall back to full dims).
TM = 256   # rows (batch*seq)
TN = 256   # output features
TK = 512   # contraction (d_model)
TF = 512   # FFN hidden chunk (d_ffn)


def _pick(dim, target):
    """Largest legal tile: `target` if it divides `dim`, else the full dim."""
    if dim >= target and dim % target == 0:
        return target
    return dim


# ----------------------------------------------------------------------------
# Kernel 1: fused multi-projection matmul  (QKV / KV / single linear)
#   o_n = x @ w_n + b_n   for n in [0, n_proj)
# ----------------------------------------------------------------------------
def _fused_proj_kernel(*refs, n_proj):
    x_ref = refs[0]
    w_refs = refs[1:1 + n_proj]
    b_refs = refs[1 + n_proj:1 + 2 * n_proj]
    o_refs = refs[1 + 2 * n_proj:1 + 3 * n_proj]
    acc_refs = refs[1 + 3 * n_proj:1 + 4 * n_proj]
    k_id = pl.program_id(2)

    @pl.when(k_id == 0)
    def _():
        for acc in acc_refs:
            acc[...] = jnp.zeros_like(acc)

    x = x_ref[...]
    for w_ref, acc in zip(w_refs, acc_refs):
        acc[...] += jnp.dot(x, w_ref[...], preferred_element_type=jnp.float32)

    @pl.when(k_id == pl.num_programs(2) - 1)
    def _():
        for b_ref, o_ref, acc in zip(b_refs, o_refs, acc_refs):
            o_ref[...] = (acc[...] + b_ref[...]).astype(o_ref.dtype)


def fused_linear(x, ws, bs):
    """x:(M,K); ws: tuple of (K,N); bs: tuple of (N,). Returns list of (M,N)."""
    M, K = x.shape
    n = len(ws)
    N = ws[0].shape[1]
    tm, tn, tk = _pick(M, TM), _pick(N, TN), _pick(K, TK)
    grid = (M // tm, N // tn, K // tk)

    in_specs = [pl.BlockSpec((tm, tk), lambda i, j, k: (i, k))]
    in_specs += [pl.BlockSpec((tk, tn), lambda i, j, k: (k, j)) for _ in range(n)]
    in_specs += [pl.BlockSpec((1, tn), lambda i, j, k: (0, j)) for _ in range(n)]
    out_specs = [pl.BlockSpec((tm, tn), lambda i, j, k: (i, j)) for _ in range(n)]
    out_shape = [jax.ShapeDtypeStruct((M, N), x.dtype) for _ in range(n)]
    scratch = [pltpu.VMEM((tm, tn), jnp.float32) for _ in range(n)]

    return pl.pallas_call(
        functools.partial(_fused_proj_kernel, n_proj=n),
        out_shape=out_shape,
        grid=grid,
        in_specs=in_specs,
        out_specs=out_specs,
        scratch_shapes=scratch,
        compiler_params=pltpu.CompilerParams(
            dimension_semantics=("parallel", "parallel", "arbitrary")),
    )(x, *ws, *[b.reshape(1, N) for b in bs])


# ----------------------------------------------------------------------------
# Kernel 2: matmul + bias + residual-add + LayerNorm epilogue
#   o = LayerNorm(x @ w + b + residual)
# ----------------------------------------------------------------------------
def _matmul_add_ln_kernel(x_ref, w_ref, b_ref, r_ref, g_ref, bt_ref, o_ref, acc_ref, *, eps):
    k_id = pl.program_id(1)

    @pl.when(k_id == 0)
    def _():
        acc_ref[...] = jnp.zeros_like(acc_ref)

    acc_ref[...] += jnp.dot(x_ref[...], w_ref[...], preferred_element_type=jnp.float32)

    @pl.when(k_id == pl.num_programs(1) - 1)
    def _():
        z = acc_ref[...] + b_ref[...] + r_ref[...]
        mean = jnp.mean(z, axis=-1, keepdims=True)
        var = jnp.mean(jnp.square(z - mean), axis=-1, keepdims=True)
        zn = (z - mean) * jax.lax.rsqrt(var + eps)
        o_ref[...] = (zn * g_ref[...] + bt_ref[...]).astype(o_ref.dtype)


def matmul_add_ln(x, w, b, residual, gamma, beta, eps=1e-5):
    """x:(M,K) @ w:(K,N) + b, + residual:(M,N), then LayerNorm over N."""
    M, K = x.shape
    N = w.shape[1]
    tm, tk = _pick(M, TM), _pick(K, TK)
    grid = (M // tm, K // tk)
    return pl.pallas_call(
        functools.partial(_matmul_add_ln_kernel, eps=eps),
        out_shape=jax.ShapeDtypeStruct((M, N), x.dtype),
        grid=grid,
        in_specs=[
            pl.BlockSpec((tm, tk), lambda i, k: (i, k)),   # x
            pl.BlockSpec((tk, N), lambda i, k: (k, 0)),    # w
            pl.BlockSpec((1, N), lambda i, k: (0, 0)),     # bias
            pl.BlockSpec((tm, N), lambda i, k: (i, 0)),    # residual
            pl.BlockSpec((1, N), lambda i, k: (0, 0)),     # gamma
            pl.BlockSpec((1, N), lambda i, k: (0, 0)),     # beta
        ],
        out_specs=pl.BlockSpec((tm, N), lambda i, k: (i, 0)),
        scratch_shapes=[pltpu.VMEM((tm, N), jnp.float32)],
        compiler_params=pltpu.CompilerParams(
            dimension_semantics=("parallel", "arbitrary")),
    )(x, w, b.reshape(1, N), residual, gamma.reshape(1, N), beta.reshape(1, N))


# ----------------------------------------------------------------------------
# Kernel 3: fused FFN + residual + LayerNorm
#   o = LayerNorm( relu(x @ w1 + b1) @ w2 + b2 + x )
# d_ffn is chunked; the (M, d_ffn) intermediate never leaves VMEM.
# ----------------------------------------------------------------------------
def _ffn_add_ln_kernel(x_ref, w1_ref, b1_ref, w2_ref, b2_ref, g_ref, bt_ref,
                       o_ref, acc_ref, *, eps):
    f_id = pl.program_id(1)

    @pl.when(f_id == 0)
    def _():
        acc_ref[...] = jnp.zeros_like(acc_ref)

    h = jnp.dot(x_ref[...], w1_ref[...], preferred_element_type=jnp.float32) + b1_ref[...]
    h = jnp.maximum(h, 0.0)
    acc_ref[...] += jnp.dot(h, w2_ref[...], preferred_element_type=jnp.float32)

    @pl.when(f_id == pl.num_programs(1) - 1)
    def _():
        z = acc_ref[...] + b2_ref[...] + x_ref[...]          # residual = FFN input
        mean = jnp.mean(z, axis=-1, keepdims=True)
        var = jnp.mean(jnp.square(z - mean), axis=-1, keepdims=True)
        zn = (z - mean) * jax.lax.rsqrt(var + eps)
        o_ref[...] = (zn * g_ref[...] + bt_ref[...]).astype(o_ref.dtype)


def ffn_add_ln(x, w1, b1, w2, b2, gamma, beta, eps=1e-5):
    M, D = x.shape
    F = w1.shape[1]
    tm, tf = _pick(M, TM), _pick(F, TF)
    grid = (M // tm, F // tf)
    return pl.pallas_call(
        functools.partial(_ffn_add_ln_kernel, eps=eps),
        out_shape=jax.ShapeDtypeStruct((M, D), x.dtype),
        grid=grid,
        in_specs=[
            pl.BlockSpec((tm, D), lambda i, f: (i, 0)),    # x (also the residual)
            pl.BlockSpec((D, tf), lambda i, f: (0, f)),    # w1 chunk
            pl.BlockSpec((1, tf), lambda i, f: (0, f)),    # b1 chunk
            pl.BlockSpec((tf, D), lambda i, f: (f, 0)),    # w2 chunk
            pl.BlockSpec((1, D), lambda i, f: (0, 0)),     # b2
            pl.BlockSpec((1, D), lambda i, f: (0, 0)),     # gamma
            pl.BlockSpec((1, D), lambda i, f: (0, 0)),     # beta
        ],
        out_specs=pl.BlockSpec((tm, D), lambda i, f: (i, 0)),
        scratch_shapes=[pltpu.VMEM((tm, D), jnp.float32)],
        compiler_params=pltpu.CompilerParams(
            dimension_semantics=("parallel", "arbitrary")),
    )(x, w1, b1.reshape(1, F), w2, b2.reshape(1, D),
      gamma.reshape(1, D), beta.reshape(1, D))


# ----------------------------------------------------------------------------
# Kernel 4: multi-head scaled dot-product attention.
# One grid step per batch element; all heads processed together; combined-head
# (S, D) output written lane-dense. Causal mask generated in-kernel via iota.
# ----------------------------------------------------------------------------
def _attn_kernel(q_ref, k_ref, v_ref, *rest, n_heads, scale, mask_mode):
    o_ref = rest[-1]
    q = q_ref[0]                      # (Sq, D)
    k = k_ref[0]                      # (Sk, D)
    v = v_ref[0]                      # (Sk, D)
    Sq, D = q.shape
    Sk = k.shape[0]
    Dh = D // n_heads

    if mask_mode == "causal":
        rows = jax.lax.broadcasted_iota(jnp.int32, (Sq, Sk), 0)
        cols = jax.lax.broadcasted_iota(jnp.int32, (Sq, Sk), 1)
        allow = cols <= rows
    elif mask_mode == "dense":
        allow = rest[0][0] != 0       # (Sq, Sk) bool, True = attend
    else:
        allow = None

    outs = []
    for h in range(n_heads):          # unrolled; heads share the resident q/k/v tiles
        lo = h * Dh
        qh = q[:, lo:lo + Dh]
        kh = k[:, lo:lo + Dh]
        vh = v[:, lo:lo + Dh]
        s = jax.lax.dot_general(qh, kh, (((1,), (1,)), ((), ())),
                                preferred_element_type=jnp.float32) * scale
        if allow is not None:
            s = jnp.where(allow, s, -1e30)
        s = s - jnp.max(s, axis=-1, keepdims=True)
        p = jnp.exp(s)
        p = p * pl.reciprocal(jnp.sum(p, axis=-1, keepdims=True), approx=True)
        outs.append(jnp.dot(p, vh, preferred_element_type=jnp.float32))

    o_ref[0] = jnp.concatenate(outs, axis=-1).astype(o_ref.dtype)


def attention(q, k, v, mask, n_heads):
    """q:(B,Sq,D) k,v:(B,Sk,D); mask is None | "causal" | (B,Sq,Sk) bool/int array."""
    B, Sq, D = q.shape
    Sk = k.shape[1]
    if mask is None:
        mask_mode = "none"
    elif isinstance(mask, str):
        assert mask == "causal"
        mask_mode = "causal"
    else:
        mask_mode = "dense"

    in_specs = [
        pl.BlockSpec((1, Sq, D), lambda b: (b, 0, 0)),
        pl.BlockSpec((1, Sk, D), lambda b: (b, 0, 0)),
        pl.BlockSpec((1, Sk, D), lambda b: (b, 0, 0)),
    ]
    args = [q, k, v]
    if mask_mode == "dense":
        in_specs.append(pl.BlockSpec((1, Sq, Sk), lambda b: (b, 0, 0)))
        args.append((mask != 0).astype(jnp.int8))   # compact mask, no f32 additive tensor

    return pl.pallas_call(
        functools.partial(_attn_kernel, n_heads=n_heads,
                          scale=1.0 / math.sqrt(D // n_heads), mask_mode=mask_mode),
        out_shape=jax.ShapeDtypeStruct((B, Sq, D), q.dtype),
        grid=(B,),
        in_specs=in_specs,
        out_specs=pl.BlockSpec((1, Sq, D), lambda b: (b, 0, 0)),
        compiler_params=pltpu.CompilerParams(dimension_semantics=("parallel",)),
    )(*args)


# ----------------------------------------------------------------------------
# Decoder block / decoder (glue around the kernels)
# ----------------------------------------------------------------------------
def decoder_block(p, x, enc_out, self_mask, cross_mask, n_heads):
    B, S, D = x.shape
    Se = enc_out.shape[1]
    x2 = x.reshape(B * S, D)
    enc2 = enc_out.reshape(B * Se, D)

    # --- self-attention: fused QKV proj -> attention -> fused (out-proj + residual + pre_norm)
    sp = p["self_attn"]
    q, k, v = fused_linear(x2, (sp["wq"], sp["wk"], sp["wv"]),
                           (sp["bq"], sp["bk"], sp["bv"]))
    sa = attention(q.reshape(B, S, D), k.reshape(B, S, D), v.reshape(B, S, D),
                   self_mask, n_heads)
    x2 = matmul_add_ln(sa.reshape(B * S, D), sp["wo"], sp["bo"], x2,
                       p["pre_norm_g"], p["pre_norm_b"])

    # --- cross-attention: q proj, fused KV proj of encoder output
    cp = p["cross_attn"]
    (qc,) = fused_linear(x2, (cp["wq"],), (cp["bq"],))
    kc, vc = fused_linear(enc2, (cp["wk"], cp["wv"]), (cp["bk"], cp["bv"]))
    ca = attention(qc.reshape(B, S, D), kc.reshape(B, Se, D), vc.reshape(B, Se, D),
                   cross_mask, n_heads)
    x2 = matmul_add_ln(ca.reshape(B * S, D), cp["wo"], cp["bo"], x2,
                       p["cross_norm_g"], p["cross_norm_b"])

    # --- fused FFN + residual + post_norm
    x2 = ffn_add_ln(x2, p["w1"], p["b1"], p["w2"], p["b2"],
                    p["post_norm_g"], p["post_norm_b"])
    return x2.reshape(B, S, D)


def decoder_forward(params, tokens, enc_out, self_mask=None, cross_mask=None, *, n_heads):
    B, S = tokens.shape
    # Embedding gather + positional add kept as XLA glue (cheap, data-dependent gather).
    x = jnp.take(params["embedding"], tokens, axis=0)          # (B, S, D)
    x = x + params["pos_enc"][None, :S, :]
    for blk in params["blocks"]:
        x = decoder_block(blk, x, enc_out, self_mask, cross_mask, n_heads)
    return x


# ----------------------------------------------------------------------------
# Deterministic parameter init (synthetic; no checkpoint load)
# ----------------------------------------------------------------------------
def sinusoidal_pos_enc(seq_len, d_model):
    pos = jnp.arange(seq_len, dtype=jnp.float32)[:, None]
    div = jnp.exp(jnp.arange(0, d_model, 2, dtype=jnp.float32)
                  * (-math.log(10000.0) / d_model))
    pe = jnp.zeros((seq_len, d_model), jnp.float32)
    pe = pe.at[:, 0::2].set(jnp.sin(pos * div))
    pe = pe.at[:, 1::2].set(jnp.cos(pos * div))
    return pe


def init_mha_params(key, d_model):
    ks = jax.random.split(key, 4)
    s = 0.02
    return {
        "wq": s * jax.random.normal(ks[0], (d_model, d_model), jnp.float32),
        "bq": jnp.zeros((d_model,), jnp.float32),
        "wk": s * jax.random.normal(ks[1], (d_model, d_model), jnp.float32),
        "bk": jnp.zeros((d_model,), jnp.float32),
        "wv": s * jax.random.normal(ks[2], (d_model, d_model), jnp.float32),
        "bv": jnp.zeros((d_model,), jnp.float32),
        "wo": s * jax.random.normal(ks[3], (d_model, d_model), jnp.float32),
        "bo": jnp.zeros((d_model,), jnp.float32),
    }


def init_block_params(key, d_model, d_ffn):
    ks = jax.random.split(key, 4)
    s = 0.02
    return {
        "self_attn": init_mha_params(ks[0], d_model),
        "cross_attn": init_mha_params(ks[1], d_model),
        "pre_norm_g": jnp.ones((d_model,), jnp.float32),
        "pre_norm_b": jnp.zeros((d_model,), jnp.float32),
        "cross_norm_g": jnp.ones((d_model,), jnp.float32),
        "cross_norm_b": jnp.zeros((d_model,), jnp.float32),
        "w1": s * jax.random.normal(ks[2], (d_model, d_ffn), jnp.float32),
        "b1": jnp.zeros((d_ffn,), jnp.float32),
        "w2": s * jax.random.normal(ks[3], (d_ffn, d_model), jnp.float32),
        "b2": jnp.zeros((d_model,), jnp.float32),
        "post_norm_g": jnp.ones((d_model,), jnp.float32),
        "post_norm_b": jnp.zeros((d_model,), jnp.float32),
    }


def init_decoder_params(key, vocab_size, seq_len, d_model, d_ffn, n_blocks):
    ks = jax.random.split(key, n_blocks + 1)
    return {
        "embedding": 0.02 * jax.random.normal(ks[0], (vocab_size, d_model), jnp.float32),
        "pos_enc": sinusoidal_pos_enc(seq_len, d_model),
        "blocks": [init_block_params(ks[i + 1], d_model, d_ffn) for i in range(n_blocks)],
    }


# ----------------------------------------------------------------------------
# Demo
# ----------------------------------------------------------------------------
if __name__ == "__main__":
    vocab_size = 50
    seq_len = 8          # decoder sequence length
    seq_len_enc = 8      # encoder sequence length
    d_model = 32
    n_heads = 4
    n_blocks = 2
    d_ffn = 64
    batch = 2

    key = jax.random.PRNGKey(0)
    k_tok, k_enc, k_par = jax.random.split(key, 3)

    tokens = jax.random.randint(k_tok, (batch, seq_len), 0, vocab_size, dtype=jnp.int32)
    enc_out = jax.random.normal(k_enc, (batch, seq_len_enc, d_model), jnp.float32)

    params = init_decoder_params(k_par, vocab_size, seq_len, d_model, d_ffn, n_blocks)

    # Causal self-attention mask generated inside the attention kernel (iota); no cross mask.
    # (Equivalent to passing a lower-triangular boolean mask to the PyTorch module.)
    fwd = jax.jit(lambda p, t, e: decoder_forward(
        p, t, e, self_mask="causal", cross_mask=None, n_heads=n_heads))

    out = fwd(params, tokens, enc_out)
    out = jax.block_until_ready(out)

    assert out.shape == (batch, seq_len, d_model)
    assert bool(jnp.all(jnp.isfinite(out)))
    print("KERNEL_OK")
</pallas_src>

<mosaic_0001>
module attributes {stable_mosaic.version = 11 : i64} {
  func.func @_fused_proj_kernel(%arg0: i32, %arg1: i32, %arg2: i32, %arg3: memref<16x32xf32, #tpu.memory_space<vmem>>, %arg4: memref<32x32xf32, #tpu.memory_space<vmem>>, %arg5: memref<32x32xf32, #tpu.memory_space<vmem>>, %arg6: memref<32x32xf32, #tpu.memory_space<vmem>>, %arg7: memref<1x32xf32, #tpu.memory_space<vmem>>, %arg8: memref<1x32xf32, #tpu.memory_space<vmem>>, %arg9: memref<1x32xf32, #tpu.memory_space<vmem>>, %arg10: memref<16x32xf32, #tpu.memory_space<vmem>>, %arg11: memref<16x32xf32, #tpu.memory_space<vmem>>, %arg12: memref<16x32xf32, #tpu.memory_space<vmem>>, %arg13: memref<16x32xf32, #tpu.memory_space<vmem>>, %arg14: memref<16x32xf32, #tpu.memory_space<vmem>>, %arg15: memref<16x32xf32, #tpu.memory_space<vmem>>) attributes {dimension_semantics = [#tpu.dimension_semantics<parallel>, #tpu.dimension_semantics<parallel>, #tpu.dimension_semantics<arbitrary>], iteration_bounds = array<i64: 1, 1, 1>, scalar_prefetch = 0 : i64, scratch_operands = 3 : i64, tpu.core_type = #tpu.core_type<tc>, window_params = [{transform_indices = @transform_0, window_bounds = array<i64: 16, 32>}, {transform_indices = @transform_1, window_bounds = array<i64: 32, 32>}, {transform_indices = @transform_2, window_bounds = array<i64: 32, 32>}, {transform_indices = @transform_3, window_bounds = array<i64: 32, 32>}, {transform_indices = @transform_4, window_bounds = array<i64: 1, 32>}, {transform_indices = @transform_5, window_bounds = array<i64: 1, 32>}, {transform_indices = @transform_6, window_bounds = array<i64: 1, 32>}, {transform_indices = @transform_7, window_bounds = array<i64: 16, 32>}, {transform_indices = @transform_8, window_bounds = array<i64: 16, 32>}, {transform_indices = @transform_9, window_bounds = array<i64: 16, 32>}]} {
    %c0_i32 = arith.constant 0 : i32
    %0 = arith.cmpi eq, %arg2, %c0_i32 : i32
    %1 = arith.extui %0 : i1 to i32
    %c0_i32_0 = arith.constant 0 : i32
    %2 = arith.cmpi ne, %1, %c0_i32_0 : i32
    scf.if %2 {
      %cst_24 = arith.constant 0.000000e+00 : f32
      %22 = vector.broadcast %cst_24 : f32 to vector<16x32xf32>
      %c0_25 = arith.constant 0 : index
      %c0_26 = arith.constant 0 : index
      %23 = vector.load %arg13[%c0_25, %c0_26] : memref<16x32xf32, #tpu.memory_space<vmem>>, vector<16x32xf32>
      tpu.vector_store %arg13[%c0_25, %c0_26], %22 {strides = array<i32>} : memref<16x32xf32, #tpu.memory_space<vmem>>, vector<16x32xf32>,
      %cst_27 = arith.constant 0.000000e+00 : f32
      %24 = vector.broadcast %cst_27 : f32 to vector<16x32xf32>
      %c0_28 = arith.constant 0 : index
      %c0_29 = arith.constant 0 : index
      %25 = vector.load %arg14[%c0_28, %c0_29] : memref<16x32xf32, #tpu.memory_space<vmem>>, vector<16x32xf32>
      tpu.vector_store %arg14[%c0_28, %c0_29], %24 {strides = array<i32>} : memref<16x32xf32, #tpu.memory_space<vmem>>, vector<16x32xf32>,
      %cst_30 = arith.constant 0.000000e+00 : f32
      %26 = vector.broadcast %cst_30 : f32 to vector<16x32xf32>
      %c0_31 = arith.constant 0 : index
      %c0_32 = arith.constant 0 : index
      %27 = vector.load %arg15[%c0_31, %c0_32] : memref<16x32xf32, #tpu.memory_space<vmem>>, vector<16x32xf32>
      tpu.vector_store %arg15[%c0_31, %c0_32], %26 {strides = array<i32>} : memref<16x32xf32, #tpu.memory_space<vmem>>, vector<16x32xf32>,
    } else {
    }
    %c0 = arith.constant 0 : index
    %c0_1 = arith.constant 0 : index
    %3 = vector.load %arg3[%c0, %c0_1] : memref<16x32xf32, #tpu.memory_space<vmem>>, vector<16x32xf32>
    %c0_2 = arith.constant 0 : index
    %c0_3 = arith.constant 0 : index
    %4 = vector.load %arg13[%c0_2, %c0_3] : memref<16x32xf32, #tpu.memory_space<vmem>>, vector<16x32xf32>
    %c0_4 = arith.constant 0 : index
    %c0_5 = arith.constant 0 : index
    %5 = vector.load %arg4[%c0_4, %c0_5] : memref<32x32xf32, #tpu.memory_space<vmem>>, vector<32x32xf32>
    %cst = arith.constant dense<0.000000e+00> : vector<16x32xf32>
    %6 = tpu.matmul %3, %5, %cst {dimension_numbers = #tpu.dot_dimension_numbers<[1], [0], [0], [1], [0, 0, 1, 1], [], []>} : vector<16x32xf32>, vector<32x32xf32>, vector<16x32xf32> -> vector<16x32xf32>
    %7 = arith.addf %4, %6 : vector<16x32xf32>
    %c0_6 = arith.constant 0 : index
    %c0_7 = arith.constant 0 : index
    %8 = vector.load %arg13[%c0_6, %c0_7] : memref<16x32xf32, #tpu.memory_space<vmem>>, vector<16x32xf32>
    tpu.vector_store %arg13[%c0_6, %c0_7], %7 {strides = array<i32>} : memref<16x32xf32, #tpu.memory_space<vmem>>, vector<16x32xf32>,
    %c0_8 = arith.constant 0 : index
    %c0_9 = arith.constant 0 : index
    %9 = vector.load %arg14[%c0_8, %c0_9] : memref<16x32xf32, #tpu.memory_space<vmem>>, vector<16x32xf32>
    %c0_10 = arith.constant 0 : index
    %c0_11 = arith.constant 0 : index
    %10 = vector.load %arg5[%c0_10, %c0_11] : memref<32x32xf32, #tpu.memory_space<vmem>>, vector<32x32xf32>
    %cst_12 = arith.constant dense<0.000000e+00> : vector<16x32xf32>
    %11 = tpu.matmul %3, %10, %cst_12 {dimension_numbers = #tpu.dot_dimension_numbers<[1], [0], [0], [1], [0, 0, 1, 1], [], []>} : vector<16x32xf32>, vector<32x32xf32>, vector<16x32xf32> -> vector<16x32xf32>
    %12 = arith.addf %9, %11 : vector<16x32xf32>
    %c0_13 = arith.constant 0 : index
    %c0_14 = arith.constant 0 : index
    %13 = vector.load %arg14[%c0_13, %c0_14] : memref<16x32xf32, #tpu.memory_space<vmem>>, vector<16x32xf32>
    tpu.vector_store %arg14[%c0_13, %c0_14], %12 {strides = array<i32>} : memref<16x32xf32, #tpu.memory_space<vmem>>, vector<16x32xf32>,
    %c0_15 = arith.constant 0 : index
    %c0_16 = arith.constant 0 : index
    %14 = vector.load %arg15[%c0_15, %c0_16] : memref<16x32xf32, #tpu.memory_space<vmem>>, vector<16x32xf32>
    %c0_17 = arith.constant 0 : index
    %c0_18 = arith.constant 0 : index
    %15 = vector.load %arg6[%c0_17, %c0_18] : memref<32x32xf32, #tpu.memory_space<vmem>>, vector<32x32xf32>
    %cst_19 = arith.constant dense<0.000000e+00> : vector<16x32xf32>
    %16 = tpu.matmul %3, %15, %cst_19 {dimension_numbers = #tpu.dot_dimension_numbers<[1], [0], [0], [1], [0, 0, 1, 1], [], []>} : vector<16x32xf32>, vector<32x32xf32>, vector<16x32xf32> -> vector<16x32xf32>
    %17 = arith.addf %14, %16 : vector<16x32xf32>
    %c0_20 = arith.constant 0 : index
    %c0_21 = arith.constant 0 : index
    %18 = vector.load %arg15[%c0_20, %c0_21] : memref<16x32xf32, #tpu.memory_space<vmem>>, vector<16x32xf32>
    tpu.vector_store %arg15[%c0_20, %c0_21], %17 {strides = array<i32>} : memref<16x32xf32, #tpu.memory_space<vmem>>, vector<16x32xf32>,
    %c0_i32_22 = arith.constant 0 : i32
    %19 = arith.cmpi eq, %arg2, %c0_i32_22 : i32
    %20 = arith.extui %19 : i1 to i32
    %c0_i32_23 = arith.constant 0 : i32
    %21 = arith.cmpi ne, %20, %c0_i32_23 : i32
    scf.if %21 {
      %c0_24 = arith.constant 0 : index
      %c0_25 = arith.constant 0 : index
      %22 = vector.load %arg13[%c0_24, %c0_25] : memref<16x32xf32, #tpu.memory_space<vmem>>, vector<16x32xf32>
      %c0_26 = arith.constant 0 : index
      %c0_27 = arith.constant 0 : index
      %23 = vector.load %arg7[%c0_26, %c0_27] : memref<1x32xf32, #tpu.memory_space<vmem>>, vector<1x32xf32>
      %24 = vector.broadcast %23 : vector<1x32xf32> to vector<16x32xf32>
      %25 = arith.addf %22, %24 : vector<16x32xf32>
      %c0_28 = arith.constant 0 : index
      %c0_29 = arith.constant 0 : index
      %26 = vector.load %arg10[%c0_28, %c0_29] : memref<16x32xf32, #tpu.memory_space<vmem>>, vector<16x32xf32>
      tpu.vector_store %arg10[%c0_28, %c0_29], %25 {strides = array<i32>} : memref<16x32xf32, #tpu.memory_space<vmem>>, vector<16x32xf32>,
      %c0_30 = arith.constant 0 : index
      %c0_31 = arith.constant 0 : index
      %27 = vector.load %arg14[%c0_30, %c0_31] : memref<16x32xf32, #tpu.memory_space<vmem>>, vector<16x32xf32>
      %c0_32 = arith.constant 0 : index
      %c0_33 = arith.constant 0 : index
      %28 = vector.load %arg8[%c0_32, %c0_33] : memref<1x32xf32, #tpu.memory_space<vmem>>, vector<1x32xf32>
      %29 = vector.broadcast %28 : vector<1x32xf32> to vector<16x32xf32>
      %30 = arith.addf %27, %29 : vector<16x32xf32>
      %c0_34 = arith.constant 0 : index
      %c0_35 = arith.constant 0 : index
      %31 = vector.load %arg11[%c0_34, %c0_35] : memref<16x32xf32, #tpu.memory_space<vmem>>, vector<16x32xf32>
      tpu.vector_store %arg11[%c0_34, %c0_35], %30 {strides = array<i32>} : memref<16x32xf32, #tpu.memory_space<vmem>>, vector<16x32xf32>,
      %c0_36 = arith.constant 0 : index
      %c0_37 = arith.constant 0 : index
      %32 = vector.load %arg15[%c0_36, %c0_37] : memref<16x32xf32, #tpu.memory_space<vmem>>, vector<16x32xf32>
      %c0_38 = arith.constant 0 : index
      %c0_39 = arith.constant 0 : index
      %33 = vector.load %arg9[%c0_38, %c0_39] : memref<1x32xf32, #tpu.memory_space<vmem>>, vector<1x32xf32>
      %34 = vector.broadcast %33 : vector<1x32xf32> to vector<16x32xf32>
      %35 = arith.addf %32, %34 : vector<16x32xf32>
      %c0_40 = arith.constant 0 : index
      %c0_41 = arith.constant 0 : index
      %36 = vector.load %arg12[%c0_40, %c0_41] : memref<16x32xf32, #tpu.memory_space<vmem>>, vector<16x32xf32>
      tpu.vector_store %arg12[%c0_40, %c0_41], %35 {strides = array<i32>} : memref<16x32xf32, #tpu.memory_space<vmem>>, vector<16x32xf32>,
    } else {
    }
    return
  }
  func.func @transform_0(%arg0: i32, %arg1: i32, %arg2: i32) -> (i32, i32) {
    %c0_i32 = arith.constant 0 : i32
    return %arg0, %arg2 : i32, i32
  }
  func.func @transform_1(%arg0: i32, %arg1: i32, %arg2: i32) -> (i32, i32) {
    %c0_i32 = arith.constant 0 : i32
    return %arg2, %arg1 : i32, i32
  }
  func.func @transform_2(%arg0: i32, %arg1: i32, %arg2: i32) -> (i32, i32) {
    %c0_i32 = arith.constant 0 : i32
    return %arg2, %arg1 : i32, i32
  }
  func.func @transform_3(%arg0: i32, %arg1: i32, %arg2: i32) -> (i32, i32) {
    %c0_i32 = arith.constant 0 : i32
    return %arg2, %arg1 : i32, i32
  }
  func.func @transform_4(%arg0: i32, %arg1: i32, %arg2: i32) -> (i32, i32) {
    %c0_i32 = arith.constant 0 : i32
    %c0_i32_0 = arith.constant 0 : i32
    return %c0_i32, %arg1 : i32, i32
  }
  func.func @transform_5(%arg0: i32, %arg1: i32, %arg2: i32) -> (i32, i32) {
    %c0_i32 = arith.constant 0 : i32
    %c0_i32_0 = arith.constant 0 : i32
    return %c0_i32, %arg1 : i32, i32
  }
  func.func @transform_6(%arg0: i32, %arg1: i32, %arg2: i32) -> (i32, i32) {
    %c0_i32 = arith.constant 0 : i32
    %c0_i32_0 = arith.constant 0 : i32
    return %c0_i32, %arg1 : i32, i32
  }
  func.func @transform_7(%arg0: i32, %arg1: i32, %arg2: i32) -> (i32, i32) {
    %c0_i32 = arith.constant 0 : i32
    return %arg0, %arg1 : i32, i32
  }
  func.func @transform_8(%arg0: i32, %arg1: i32, %arg2: i32) -> (i32, i32) {
    %c0_i32 = arith.constant 0 : i32
    return %arg0, %arg1 : i32, i32
  }
  func.func @transform_9(%arg0: i32, %arg1: i32, %arg2: i32) -> (i32, i32) {
    %c0_i32 = arith.constant 0 : i32
    return %arg0, %arg1 : i32, i32
  }
}

module attributes {stable_mosaic.version = 11 : i64} {
  func.func @_matmul_add_ln_kernel(%arg0: i32, %arg1: i32, %arg2: memref<16x32xf32, #tpu.memory_space<vmem>>, %arg3: memref<32x32xf32, #tpu.memory_space<vmem>>, %arg4: memref<1x32xf32, #tpu.memory_space<vmem>>, %arg5: memref<16x32xf32, #tpu.memory_space<vmem>>, %arg6: memref<1x32xf32, #tpu.memory_space<vmem>>, %arg7: memref<1x32xf32, #tpu.memory_space<vmem>>, %arg8: memref<16x32xf32, #tpu.memory_space<vmem>>, %arg9: memref<16x32xf32, #tpu.memory_space<vmem>>) attributes {dimension_semantics = [#tpu.dimension_semantics<parallel>, #tpu.dimension_semantics<arbitrary>], iteration_bounds = array<i64: 1, 1>, scalar_prefetch = 0 : i64, scratch_operands = 1 : i64, tpu.core_type = #tpu.core_type<tc>, window_params = [{transform_indices = @transform_0, window_bounds = array<i64: 16, 32>}, {transform_indices = @transform_1, window_bounds = array<i64: 32, 32>}, {pipeline_mode = #tpu.pipeline_mode<synchronous>, transform_indices = @transform_2, window_bounds = array<i64: 1, 32>}, {transform_indices = @transform_3, window_bounds = array<i64: 16, 32>}, {pipeline_mode = #tpu.pipeline_mode<synchronous>, transform_indices = @transform_4, window_bounds = array<i64: 1, 32>}, {pipeline_mode = #tpu.pipeline_mode<synchronous>, transform_indices = @transform_5, window_bounds = array<i64: 1, 32>}, {transform_indices = @transform_6, window_bounds = array<i64: 16, 32>}]} {
    %c0_i32 = arith.constant 0 : i32
    %0 = arith.cmpi eq, %arg1, %c0_i32 : i32
    %1 = arith.extui %0 : i1 to i32
    %c0_i32_0 = arith.constant 0 : i32
    %2 = arith.cmpi ne, %1, %c0_i32_0 : i32
    scf.if %2 {
      %cst_10 = arith.constant 0.000000e+00 : f32
      %12 = vector.broadcast %cst_10 : f32 to vector<16x32xf32>
      %c0_11 = arith.constant 0 : index
      %c0_12 = arith.constant 0 : index
      %13 = vector.load %arg9[%c0_11, %c0_12] : memref<16x32xf32, #tpu.memory_space<vmem>>, vector<16x32xf32>
      tpu.vector_store %arg9[%c0_11, %c0_12], %12 {strides = array<i32>} : memref<16x32xf32, #tpu.memory_space<vmem>>, vector<16x32xf32>,
    } else {
    }
    %c0 = arith.constant 0 : index
    %c0_1 = arith.constant 0 : index
    %3 = vector.load %arg9[%c0, %c0_1] : memref<16x32xf32, #tpu.memory_space<vmem>>, vector<16x32xf32>
    %c0_2 = arith.constant 0 : index
    %c0_3 = arith.constant 0 : index
    %4 = vector.load %arg2[%c0_2, %c0_3] : memref<16x32xf32, #tpu.memory_space<vmem>>, vector<16x32xf32>
    %c0_4 = arith.constant 0 : index
    %c0_5 = arith.constant 0 : index
    %5 = vector.load %arg3[%c0_4, %c0_5] : memref<32x32xf32, #tpu.memory_space<vmem>>, vector<32x32xf32>
    %cst = arith.constant dense<0.000000e+00> : vector<16x32xf32>
    %6 = tpu.matmul %4, %5, %cst {dimension_numbers = #tpu.dot_dimension_numbers<[1], [0], [0], [1], [0, 0, 1, 1], [], []>} : vector<16x32xf32>, vector<32x32xf32>, vector<16x32xf32> -> vector<16x32xf32>
    %7 = arith.addf %3, %6 : vector<16x32xf32>
    %c0_6 = arith.constant 0 : index
    %c0_7 = arith.constant 0 : index
    %8 = vector.load %arg9[%c0_6, %c0_7] : memref<16x32xf32, #tpu.memory_space<vmem>>, vector<16x32xf32>
    tpu.vector_store %arg9[%c0_6, %c0_7], %7 {strides = array<i32>} : memref<16x32xf32, #tpu.memory_space<vmem>>, vector<16x32xf32>,
    %c0_i32_8 = arith.constant 0 : i32
    %9 = arith.cmpi eq, %arg1, %c0_i32_8 : i32
    %10 = arith.extui %9 : i1 to i32
    %c0_i32_9 = arith.constant 0 : i32
    %11 = arith.cmpi ne, %10, %c0_i32_9 : i32
    scf.if %11 {
      %c0_10 = arith.constant 0 : index
      %c0_11 = arith.constant 0 : index
      %12 = vector.load %arg9[%c0_10, %c0_11] : memref<16x32xf32, #tpu.memory_space<vmem>>, vector<16x32xf32>
      %c0_12 = arith.constant 0 : index
      %c0_13 = arith.constant 0 : index
      %13 = vector.load %arg4[%c0_12, %c0_13] : memref<1x32xf32, #tpu.memory_space<vmem>>, vector<1x32xf32>
      %14 = vector.broadcast %13 : vector<1x32xf32> to vector<16x32xf32>
      %15 = arith.addf %12, %14 : vector<16x32xf32>
      %c0_14 = arith.constant 0 : index
      %c0_15 = arith.constant 0 : index
      %16 = vector.load %arg5[%c0_14, %c0_15] : memref<16x32xf32, #tpu.memory_space<vmem>>, vector<16x32xf32>
      %17 = arith.addf %15, %16 : vector<16x32xf32>
      %cst_16 = arith.constant dense<0.000000e+00> : vector<16xf32>
      %18 = vector.multi_reduction <add>, %17, %cst_16 [1] : vector<16x32xf32> to vector<16xf32>
      %19 = vector.shape_cast %18 : vector<16xf32> to vector<16x1xf32>
      %cst_17 = arith.constant 3.200000e+01 : f32
      %20 = vector.broadcast %cst_17 : f32 to vector<16x1xf32>
      %21 = arith.divf %19, %20 : vector<16x1xf32>
      %22 = vector.broadcast %21 : vector<16x1xf32> to vector<16x32xf32>
      %23 = arith.subf %17, %22 : vector<16x32xf32>
      %24 = arith.mulf %23, %23 : vector<16x32xf32>
      %cst_18 = arith.constant dense<0.000000e+00> : vector<16xf32>
      %25 = vector.multi_reduction <add>, %24, %cst_18 [1] : vector<16x32xf32> to vector<16xf32>
      %26 = vector.shape_cast %25 : vector<16xf32> to vector<16x1xf32>
      %cst_19 = arith.constant 3.200000e+01 : f32
      %27 = vector.broadcast %cst_19 : f32 to vector<16x1xf32>
      %28 = arith.divf %26, %27 : vector<16x1xf32>
      %29 = vector.broadcast %21 : vector<16x1xf32> to vector<16x32xf32>
      %30 = arith.subf %17, %29 : vector<16x32xf32>
      %cst_20 = arith.constant 9.99999974E-6 : f32
      %31 = vector.broadcast %cst_20 : f32 to vector<16x1xf32>
      %32 = arith.addf %28, %31 : vector<16x1xf32>
      %33 = math.rsqrt %32 : vector<16x1xf32>
      %34 = vector.broadcast %33 : vector<16x1xf32> to vector<16x32xf32>
      %35 = arith.mulf %30, %34 : vector<16x32xf32>
      %c0_21 = arith.constant 0 : index
      %c0_22 = arith.constant 0 : index
      %36 = vector.load %arg6[%c0_21, %c0_22] : memref<1x32xf32, #tpu.memory_space<vmem>>, vector<1x32xf32>
      %37 = vector.broadcast %36 : vector<1x32xf32> to vector<16x32xf32>
      %38 = arith.mulf %35, %37 : vector<16x32xf32>
      %c0_23 = arith.constant 0 : index
      %c0_24 = arith.constant 0 : index
      %39 = vector.load %arg7[%c0_23, %c0_24] : memref<1x32xf32, #tpu.memory_space<vmem>>, vector<1x32xf32>
      %40 = vector.broadcast %39 : vector<1x32xf32> to vector<16x32xf32>
      %41 = arith.addf %38, %40 : vector<16x32xf32>
      %c0_25 = arith.constant 0 : index
      %c0_26 = arith.constant 0 : index
      %42 = vector.load %arg8[%c0_25, %c0_26] : memref<16x32xf32, #tpu.memory_space<vmem>>, vector<16x32xf32>
      tpu.vector_store %arg8[%c0_25, %c0_26], %41 {strides = array<i32>} : memref<16x32xf32, #tpu.memory_space<vmem>>, vector<16x32xf32>,
    } else {
    }
    return
  }
  func.func @transform_0(%arg0: i32, %arg1: i32) -> (i32, i32) {
    %c0_i32 = arith.constant 0 : i32
    return %arg0, %arg1 : i32, i32
  }
  func.func @transform_1(%arg0: i32, %arg1: i32) -> (i32, i32) {
    %c0_i32 = arith.constant 0 : i32
    %c0_i32_0 = arith.constant 0 : i32
    return %arg1, %c0_i32 : i32, i32
  }
  func.func @transform_2(%arg0: i32, %arg1: i32) -> (i32, i32) {
    %c0_i32 = arith.constant 0 : i32
    %c0_i32_0 = arith.constant 0 : i32
    %c0_i32_1 = arith.constant 0 : i32
    return %c0_i32, %c0_i32_0 : i32, i32
  }
  func.func @transform_3(%arg0: i32, %arg1: i32) -> (i32, i32) {
    %c0_i32 = arith.constant 0 : i32
    %c0_i32_0 = arith.constant 0 : i32
    return %arg0, %c0_i32 : i32, i32
  }
  func.func @transform_4(%arg0: i32, %arg1: i32) -> (i32, i32) {
    %c0_i32 = arith.constant 0 : i32
    %c0_i32_0 = arith.constant 0 : i32
    %c0_i32_1 = arith.constant 0 : i32
    return %c0_i32, %c0_i32_0 : i32, i32
  }
  func.func @transform_5(%arg0: i32, %arg1: i32) -> (i32, i32) {
    %c0_i32 = arith.constant 0 : i32
    %c0_i32_0 = arith.constant 0 : i32
    %c0_i32_1 = arith.constant 0 : i32
    return %c0_i32, %c0_i32_0 : i32, i32
  }
  func.func @transform_6(%arg0: i32, %arg1: i32) -> (i32, i32) {
    %c0_i32 = arith.constant 0 : i32
    %c0_i32_0 = arith.constant 0 : i32
    return %arg0, %c0_i32 : i32, i32
  }
}

module attributes {stable_mosaic.version = 11 : i64} {
  func.func @_fused_proj_kernel(%arg0: i32, %arg1: i32, %arg2: i32, %arg3: memref<16x32xf32, #tpu.memory_space<vmem>>, %arg4: memref<32x32xf32, #tpu.memory_space<vmem>>, %arg5: memref<1x32xf32, #tpu.memory_space<vmem>>, %arg6: memref<16x32xf32, #tpu.memory_space<vmem>>, %arg7: memref<16x32xf32, #tpu.memory_space<vmem>>) attributes {dimension_semantics = [#tpu.dimension_semantics<parallel>, #tpu.dimension_semantics<parallel>, #tpu.dimension_semantics<arbitrary>], iteration_bounds = array<i64: 1, 1, 1>, scalar_prefetch = 0 : i64, scratch_operands = 1 : i64, tpu.core_type = #tpu.core_type<tc>, window_params = [{transform_indices = @transform_0, window_bounds = array<i64: 16, 32>}, {transform_indices = @transform_1, window_bounds = array<i64: 32, 32>}, {transform_indices = @transform_2, window_bounds = array<i64: 1, 32>}, {transform_indices = @transform_3, window_bounds = array<i64: 16, 32>}]} {
    %c0_i32 = arith.constant 0 : i32
    %0 = arith.cmpi eq, %arg2, %c0_i32 : i32
    %1 = arith.extui %0 : i1 to i32
    %c0_i32_0 = arith.constant 0 : i32
    %2 = arith.cmpi ne, %1, %c0_i32_0 : i32
    scf.if %2 {
      %cst_10 = arith.constant 0.000000e+00 : f32
      %12 = vector.broadcast %cst_10 : f32 to vector<16x32xf32>
      %c0_11 = arith.constant 0 : index
      %c0_12 = arith.constant 0 : index
      %13 = vector.load %arg7[%c0_11, %c0_12] : memref<16x32xf32, #tpu.memory_space<vmem>>, vector<16x32xf32>
      tpu.vector_store %arg7[%c0_11, %c0_12], %12 {strides = array<i32>} : memref<16x32xf32, #tpu.memory_space<vmem>>, vector<16x32xf32>,
    } else {
    }
    %c0 = arith.constant 0 : index
    %c0_1 = arith.constant 0 : index
    %3 = vector.load %arg3[%c0, %c0_1] : memref<16x32xf32, #tpu.memory_space<vmem>>, vector<16x32xf32>
    %c0_2 = arith.constant 0 : index
    %c0_3 = arith.constant 0 : index
    %4 = vector.load %arg7[%c0_2, %c0_3] : memref<16x32xf32, #tpu.memory_space<vmem>>, vector<16x32xf32>
    %c0_4 = arith.constant 0 : index
    %c0_5 = arith.constant 0 : index
    %5 = vector.load %arg4[%c0_4, %c0_5] : memref<32x32xf32, #tpu.memory_space<vmem>>, vector<32x32xf32>
    %cst = arith.constant dense<0.000000e+00> : vector<16x32xf32>
    %6 = tpu.matmul %3, %5, %cst {dimension_numbers = #tpu.dot_dimension_numbers<[1], [0], [0], [1], [0, 0, 1, 1], [], []>} : vector<16x32xf32>, vector<32x32xf32>, vector<16x32xf32> -> vector<16x32xf32>
    %7 = arith.addf %4, %6 : vector<16x32xf32>
    %c0_6 = arith.constant 0 : index
    %c0_7 = arith.constant 0 : index
    %8 = vector.load %arg7[%c0_6, %c0_7] : memref<16x32xf32, #tpu.memory_space<vmem>>, vector<16x32xf32>
    tpu.vector_store %arg7[%c0_6, %c0_7], %7 {strides = array<i32>} : memref<16x32xf32, #tpu.memory_space<vmem>>, vector<16x32xf32>,
    %c0_i32_8 = arith.constant 0 : i32
    %9 = arith.cmpi eq, %arg2, %c0_i32_8 : i32
    %10 = arith.extui %9 : i1 to i32
    %c0_i32_9 = arith.constant 0 : i32
    %11 = arith.cmpi ne, %10, %c0_i32_9 : i32
    scf.if %11 {
      %c0_10 = arith.constant 0 : index
      %c0_11 = arith.constant 0 : index
      %12 = vector.load %arg7[%c0_10, %c0_11] : memref<16x32xf32, #tpu.memory_space<vmem>>, vector<16x32xf32>
      %c0_12 = arith.constant 0 : index
      %c0_13 = arith.constant 0 : index
      %13 = vector.load %arg5[%c0_12, %c0_13] : memref<1x32xf32, #tpu.memory_space<vmem>>, vector<1x32xf32>
      %14 = vector.broadcast %13 : vector<1x32xf32> to vector<16x32xf32>
      %15 = arith.addf %12, %14 : vector<16x32xf32>
      %c0_14 = arith.constant 0 : index
      %c0_15 = arith.constant 0 : index
      %16 = vector.load %arg6[%c0_14, %c0_15] : memref<16x32xf32, #tpu.memory_space<vmem>>, vector<16x32xf32>
      tpu.vector_store %arg6[%c0_14, %c0_15], %15 {strides = array<i32>} : memref<16x32xf32, #tpu.memory_space<vmem>>, vector<16x32xf32>,
    } else {
    }
    return
  }
  func.func @transform_0(%arg0: i32, %arg1: i32, %arg2: i32) -> (i32, i32) {
    %c0_i32 = arith.constant 0 : i32
    return %arg0, %arg2 : i32, i32
  }
  func.func @transform_1(%arg0: i32, %arg1: i32, %arg2: i32) -> (i32, i32) {
    %c0_i32 = arith.constant 0 : i32
    return %arg2, %arg1 : i32, i32
  }
  func.func @transform_2(%arg0: i32, %arg1: i32, %arg2: i32) -> (i32, i32) {
    %c0_i32 = arith.constant 0 : i32
    %c0_i32_0 = arith.constant 0 : i32
    return %c0_i32, %arg1 : i32, i32
  }
  func.func @transform_3(%arg0: i32, %arg1: i32, %arg2: i32) -> (i32, i32) {
    %c0_i32 = arith.constant 0 : i32
    return %arg0, %arg1 : i32, i32
  }
}

module attributes {stable_mosaic.version = 11 : i64} {
  func.func @_attn_kernel(%arg0: i32, %arg1: memref<1x8x32xf32, #tpu.memory_space<vmem>>, %arg2: memref<1x8x32xf32, #tpu.memory_space<vmem>>, %arg3: memref<1x8x32xf32, #tpu.memory_space<vmem>>, %arg4: memref<1x8x32xf32, #tpu.memory_space<vmem>>) attributes {dimension_semantics = [#tpu.dimension_semantics<parallel>], iteration_bounds = array<i64: 2>, scalar_prefetch = 0 : i64, scratch_operands = 0 : i64, tpu.core_type = #tpu.core_type<tc>, window_params = [{transform_indices = @transform_0, window_bounds = array<i64: 1, 8, 32>}, {transform_indices = @transform_1, window_bounds = array<i64: 1, 8, 32>}, {transform_indices = @transform_2, window_bounds = array<i64: 1, 8, 32>}, {transform_indices = @transform_3, window_bounds = array<i64: 1, 8, 32>}]} {
    %c0 = arith.constant 0 : index
    %c0_0 = arith.constant 0 : index
    %c0_1 = arith.constant 0 : index
    %0 = vector.load %arg1[%c0, %c0_0, %c0_1] : memref<1x8x32xf32, #tpu.memory_space<vmem>>, vector<1x8x32xf32>
    %1 = vector.shape_cast %0 : vector<1x8x32xf32> to vector<8x32xf32>
    %c0_2 = arith.constant 0 : index
    %c0_3 = arith.constant 0 : index
    %c0_4 = arith.constant 0 : index
    %2 = vector.load %arg2[%c0_2, %c0_3, %c0_4] : memref<1x8x32xf32, #tpu.memory_space<vmem>>, vector<1x8x32xf32>
    %3 = vector.shape_cast %2 : vector<1x8x32xf32> to vector<8x32xf32>
    %c0_5 = arith.constant 0 : index
    %c0_6 = arith.constant 0 : index
    %c0_7 = arith.constant 0 : index
    %4 = vector.load %arg3[%c0_5, %c0_6, %c0_7] : memref<1x8x32xf32, #tpu.memory_space<vmem>>, vector<1x8x32xf32>
    %5 = vector.shape_cast %4 : vector<1x8x32xf32> to vector<8x32xf32>
    %6 = tpu.iota {dimensions = array<i32: 0>} : vector<8x8xi32>
    %7 = tpu.iota {dimensions = array<i32: 1>} : vector<8x8xi32>
    %8 = arith.cmpi sle, %7, %6 : vector<8x8xi32>
    %9 = vector.extract_strided_slice %1 {offsets = [0, 0], sizes = [8, 8], strides = [1, 1]} : vector<8x32xf32> to vector<8x8xf32>
    %10 = vector.extract_strided_slice %3 {offsets = [0, 0], sizes = [8, 8], strides = [1, 1]} : vector<8x32xf32> to vector<8x8xf32>
    %11 = vector.extract_strided_slice %5 {offsets = [0, 0], sizes = [8, 8], strides = [1, 1]} : vector<8x32xf32> to vector<8x8xf32>
    %cst = arith.constant dense<0.000000e+00> : vector<8x8xf32>
    %12 = tpu.matmul %9, %10, %cst {dimension_numbers = #tpu.dot_dimension_numbers<[1], [1], [0], [0], [0, 0, 1, 0], [], []>} : vector<8x8xf32>, vector<8x8xf32>, vector<8x8xf32> -> vector<8x8xf32>
    %cst_8 = arith.constant 0.353553385 : f32
    %13 = vector.broadcast %cst_8 : f32 to vector<8x8xf32>
    %14 = arith.mulf %12, %13 : vector<8x8xf32>
    %cst_9 = arith.constant -1.000000e+30 : f32
    %15 = vector.broadcast %cst_9 : f32 to vector<8x8xf32>
    %16 = arith.select %8, %14, %15 : vector<8x8xi1>, vector<8x8xf32>
    %cst_10 = arith.constant dense<0xFF800000> : vector<8xf32>
    %17 = vector.multi_reduction <maximumf>, %16, %cst_10 [1] : vector<8x8xf32> to vector<8xf32>
    %18 = vector.shape_cast %17 : vector<8xf32> to vector<8x1xf32>
    %19 = vector.broadcast %18 : vector<8x1xf32> to vector<8x8xf32>
    %20 = arith.subf %16, %19 : vector<8x8xf32>
    %21 = math.exp %20 : vector<8x8xf32>
    %cst_11 = arith.constant dense<0.000000e+00> : vector<8xf32>
    %22 = vector.multi_reduction <add>, %21, %cst_11 [1] : vector<8x8xf32> to vector<8xf32>
    %23 = vector.shape_cast %22 : vector<8xf32> to vector<8x1xf32>
    %24 = tpu.reciprocal %23 {approx = true} : vector<8x1xf32> -> vector<8x1xf32>
    %25 = vector.broadcast %24 : vector<8x1xf32> to vector<8x8xf32>
    %26 = arith.mulf %21, %25 : vector<8x8xf32>
    %cst_12 = arith.constant dense<0.000000e+00> : vector<8x8xf32>
    %27 = tpu.matmul %26, %11, %cst_12 {dimension_numbers = #tpu.dot_dimension_numbers<[1], [0], [0], [1], [0, 0, 1, 1], [], []>} : vector<8x8xf32>, vector<8x8xf32>, vector<8x8xf32> -> vector<8x8xf32>
    %28 = vector.extract_strided_slice %1 {offsets = [0, 8], sizes = [8, 8], strides = [1, 1]} : vector<8x32xf32> to vector<8x8xf32>
    %29 = vector.extract_strided_slice %3 {offsets = [0, 8], sizes = [8, 8], strides = [1, 1]} : vector<8x32xf32> to vector<8x8xf32>
    %30 = vector.extract_strided_slice %5 {offsets = [0, 8], sizes = [8, 8], strides = [1, 1]} : vector<8x32xf32> to vector<8x8xf32>
    %cst_13 = arith.constant dense<0.000000e+00> : vector<8x8xf32>
    %31 = tpu.matmul %28, %29, %cst_13 {dimension_numbers = #tpu.dot_dimension_numbers<[1], [1], [0], [0], [0, 0, 1, 0], [], []>} : vector<8x8xf32>, vector<8x8xf32>, vector<8x8xf32> -> vector<8x8xf32>
    %cst_14 = arith.constant 0.353553385 : f32
    %32 = vector.broadcast %cst_14 : f32 to vector<8x8xf32>
    %33 = arith.mulf %31, %32 : vector<8x8xf32>
    %cst_15 = arith.constant -1.000000e+30 : f32
    %34 = vector.broadcast %cst_15 : f32 to vector<8x8xf32>
    %35 = arith.select %8, %33, %34 : vector<8x8xi1>, vector<8x8xf32>
    %cst_16 = arith.constant dense<0xFF800000> : vector<8xf32>
    %36 = vector.multi_reduction <maximumf>, %35, %cst_16 [1] : vector<8x8xf32> to vector<8xf32>
    %37 = vector.shape_cast %36 : vector<8xf32> to vector<8x1xf32>
    %38 = vector.broadcast %37 : vector<8x1xf32> to vector<8x8xf32>
    %39 = arith.subf %35, %38 : vector<8x8xf32>
    %40 = math.exp %39 : vector<8x8xf32>
    %cst_17 = arith.constant dense<0.000000e+00> : vector<8xf32>
    %41 = vector.multi_reduction <add>, %40, %cst_17 [1] : vector<8x8xf32> to vector<8xf32>
    %42 = vector.shape_cast %41 : vector<8xf32> to vector<8x1xf32>
    %43 = tpu.reciprocal %42 {approx = true} : vector<8x1xf32> -> vector<8x1xf32>
    %44 = vector.broadcast %43 : vector<8x1xf32> to vector<8x8xf32>
    %45 = arith.mulf %40, %44 : vector<8x8xf32>
    %cst_18 = arith.constant dense<0.000000e+00> : vector<8x8xf32>
    %46 = tpu.matmul %45, %30, %cst_18 {dimension_numbers = #tpu.dot_dimension_numbers<[1], [0], [0], [1], [0, 0, 1, 1], [], []>} : vector<8x8xf32>, vector<8x8xf32>, vector<8x8xf32> -> vector<8x8xf32>
    %47 = vector.extract_strided_slice %1 {offsets = [0, 16], sizes = [8, 8], strides = [1, 1]} : vector<8x32xf32> to vector<8x8xf32>
    %48 = vector.extract_strided_slice %3 {offsets = [0, 16], sizes = [8, 8], strides = [1, 1]} : vector<8x32xf32> to vector<8x8xf32>
    %49 = vector.extract_strided_slice %5 {offsets = [0, 16], sizes = [8, 8], strides = [1, 1]} : vector<8x32xf32> to vector<8x8xf32>
    %cst_19 = arith.constant dense<0.000000e+00> : vector<8x8xf32>
    %50 = tpu.matmul %47, %48, %cst_19 {dimension_numbers = #tpu.dot_dimension_numbers<[1], [1], [0], [0], [0, 0, 1, 0], [], []>} : vector<8x8xf32>, vector<8x8xf32>, vector<8x8xf32> -> vector<8x8xf32>
    %cst_20 = arith.constant 0.353553385 : f32
    %51 = vector.broadcast %cst_20 : f32 to vector<8x8xf32>
    %52 = arith.mulf %50, %51 : vector<8x8xf32>
    %cst_21 = arith.constant -1.000000e+30 : f32
    %53 = vector.broadcast %cst_21 : f32 to vector<8x8xf32>
    %54 = arith.select %8, %52, %53 : vector<8x8xi1>, vector<8x8xf32>
    %cst_22 = arith.constant dense<0xFF800000> : vector<8xf32>
    %55 = vector.multi_reduction <maximumf>, %54, %cst_22 [1] : vector<8x8xf32> to vector<8xf32>
    %56 = vector.shape_cast %55 : vector<8xf32> to vector<8x1xf32>
    %57 = vector.broadcast %56 : vector<8x1xf32> to vector<8x8xf32>
    %58 = arith.subf %54, %57 : vector<8x8xf32>
    %59 = math.exp %58 : vector<8x8xf32>
    %cst_23 = arith.constant dense<0.000000e+00> : vector<8xf32>
    %60 = vector.multi_reduction <add>, %59, %cst_23 [1] : vector<8x8xf32> to vector<8xf32>
    %61 = vector.shape_cast %60 : vector<8xf32> to vector<8x1xf32>
    %62 = tpu.reciprocal %61 {approx = true} : vector<8x1xf32> -> vector<8x1xf32>
    %63 = vector.broadcast %62 : vector<8x1xf32> to vector<8x8xf32>
    %64 = arith.mulf %59, %63 : vector<8x8xf32>
    %cst_24 = arith.constant dense<0.000000e+00> : vector<8x8xf32>
    %65 = tpu.matmul %64, %49, %cst_24 {dimension_numbers = #tpu.dot_dimension_numbers<[1], [0], [0], [1], [0, 0, 1, 1], [], []>} : vector<8x8xf32>, vector<8x8xf32>, vector<8x8xf32> -> vector<8x8xf32>
    %66 = vector.extract_strided_slice %1 {offsets = [0, 24], sizes = [8, 8], strides = [1, 1]} : vector<8x32xf32> to vector<8x8xf32>
    %67 = vector.extract_strided_slice %3 {offsets = [0, 24], sizes = [8, 8], strides = [1, 1]} : vector<8x32xf32> to vector<8x8xf32>
    %68 = vector.extract_strided_slice %5 {offsets = [0, 24], sizes = [8, 8], strides = [1, 1]} : vector<8x32xf32> to vector<8x8xf32>
    %cst_25 = arith.constant dense<0.000000e+00> : vector<8x8xf32>
    %69 = tpu.matmul %66, %67, %cst_25 {dimension_numbers = #tpu.dot_dimension_numbers<[1], [1], [0], [0], [0, 0, 1, 0], [], []>} : vector<8x8xf32>, vector<8x8xf32>, vector<8x8xf32> -> vector<8x8xf32>
    %cst_26 = arith.constant 0.353553385 : f32
    %70 = vector.broadcast %cst_26 : f32 to vector<8x8xf32>
    %71 = arith.mulf %69, %70 : vector<8x8xf32>
    %cst_27 = arith.constant -1.000000e+30 : f32
    %72 = vector.broadcast %cst_27 : f32 to vector<8x8xf32>
    %73 = arith.select %8, %71, %72 : vector<8x8xi1>, vector<8x8xf32>
    %cst_28 = arith.constant dense<0xFF800000> : vector<8xf32>
    %74 = vector.multi_reduction <maximumf>, %73, %cst_28 [1] : vector<8x8xf32> to vector<8xf32>
    %75 = vector.shape_cast %74 : vector<8xf32> to vector<8x1xf32>
    %76 = vector.broadcast %75 : vector<8x1xf32> to vector<8x8xf32>
    %77 = arith.subf %73, %76 : vector<8x8xf32>
    %78 = math.exp %77 : vector<8x8xf32>
    %cst_29 = arith.constant dense<0.000000e+00> : vector<8xf32>
    %79 = vector.multi_reduction <add>, %78, %cst_29 [1] : vector<8x8xf32> to vector<8xf32>
    %80 = vector.shape_cast %79 : vector<8xf32> to vector<8x1xf32>
    %81 = tpu.reciprocal %80 {approx = true} : vector<8x1xf32> -> vector<8x1xf32>
    %82 = vector.broadcast %81 : vector<8x1xf32> to vector<8x8xf32>
    %83 = arith.mulf %78, %82 : vector<8x8xf32>
    %cst_30 = arith.constant dense<0.000000e+00> : vector<8x8xf32>
    %84 = tpu.matmul %83, %68, %cst_30 {dimension_numbers = #tpu.dot_dimension_numbers<[1], [0], [0], [1], [0, 0, 1, 1], [], []>} : vector<8x8xf32>, vector<8x8xf32>, vector<8x8xf32> -> vector<8x8xf32>
    %85 = tpu.concatenate %27, %46, %65, %84 in 1 : vector<8x8xf32>, vector<8x8xf32>, vector<8x8xf32>, vector<8x8xf32> -> vector<8x32xf32>
    %c0_31 = arith.constant 0 : index
    %c0_32 = arith.constant 0 : index
    %c0_33 = arith.constant 0 : index
    %86 = vector.load %arg4[%c0_31, %c0_32, %c0_33] : memref<1x8x32xf32, #tpu.memory_space<vmem>>, vector<1x8x32xf32>
    %87 = vector.shape_cast %86 : vector<1x8x32xf32> to vector<8x32xf32>
    %88 = vector.shape_cast %85 : vector<8x32xf32> to vector<1x8x32xf32>
    tpu.vector_store %arg4[%c0_31, %c0_32, %c0_33], %88 {strides = array<i32>} : memref<1x8x32xf32, #tpu.memory_space<vmem>>, vector<1x8x32xf32>,
    return
  }
  func.func @transform_0(%arg0: i32) -> (i32, i32, i32) {
    %c0_i32 = arith.constant 0 : i32
    %c0_i32_0 = arith.constant 0 : i32
    %c0_i32_1 = arith.constant 0 : i32
    return %arg0, %c0_i32, %c0_i32_0 : i32, i32, i32
  }
  func.func @transform_1(%arg0: i32) -> (i32, i32, i32) {
    %c0_i32 = arith.constant 0 : i32
    %c0_i32_0 = arith.constant 0 : i32
    %c0_i32_1 = arith.constant 0 : i32
    return %arg0, %c0_i32, %c0_i32_0 : i32, i32, i32
  }
  func.func @transform_2(%arg0: i32) -> (i32, i32, i32) {
    %c0_i32 = arith.constant 0 : i32
    %c0_i32_0 = arith.constant 0 : i32
    %c0_i32_1 = arith.constant 0 : i32
    return %arg0, %c0_i32, %c0_i32_0 : i32, i32, i32
  }
  func.func @transform_3(%arg0: i32) -> (i32, i32, i32) {
    %c0_i32 = arith.constant 0 : i32
    %c0_i32_0 = arith.constant 0 : i32
    %c0_i32_1 = arith.constant 0 : i32
    return %arg0, %c0_i32, %c0_i32_0 : i32, i32, i32
  }
}

module attributes {stable_mosaic.version = 11 : i64} {
  func.func @_fused_proj_kernel(%arg0: i32, %arg1: i32, %arg2: i32, %arg3: memref<16x32xf32, #tpu.memory_space<vmem>>, %arg4: memref<32x32xf32, #tpu.memory_space<vmem>>, %arg5: memref<32x32xf32, #tpu.memory_space<vmem>>, %arg6: memref<1x32xf32, #tpu.memory_space<vmem>>, %arg7: memref<1x32xf32, #tpu.memory_space<vmem>>, %arg8: memref<16x32xf32, #tpu.memory_space<vmem>>, %arg9: memref<16x32xf32, #tpu.memory_space<vmem>>, %arg10: memref<16x32xf32, #tpu.memory_space<vmem>>, %arg11: memref<16x32xf32, #tpu.memory_space<vmem>>) attributes {dimension_semantics = [#tpu.dimension_semantics<parallel>, #tpu.dimension_semantics<parallel>, #tpu.dimension_semantics<arbitrary>], iteration_bounds = array<i64: 1, 1, 1>, scalar_prefetch = 0 : i64, scratch_operands = 2 : i64, tpu.core_type = #tpu.core_type<tc>, window_params = [{transform_indices = @transform_0, window_bounds = array<i64: 16, 32>}, {transform_indices = @transform_1, window_bounds = array<i64: 32, 32>}, {transform_indices = @transform_2, window_bounds = array<i64: 32, 32>}, {transform_indices = @transform_3, window_bounds = array<i64: 1, 32>}, {transform_indices = @transform_4, window_bounds = array<i64: 1, 32>}, {transform_indices = @transform_5, window_bounds = array<i64: 16, 32>}, {transform_indices = @transform_6, window_bounds = array<i64: 16, 32>}]} {
    %c0_i32 = arith.constant 0 : i32
    %0 = arith.cmpi eq, %arg2, %c0_i32 : i32
    %1 = arith.extui %0 : i1 to i32
    %c0_i32_0 = arith.constant 0 : i32
    %2 = arith.cmpi ne, %1, %c0_i32_0 : i32
    scf.if %2 {
      %cst_17 = arith.constant 0.000000e+00 : f32
      %17 = vector.broadcast %cst_17 : f32 to vector<16x32xf32>
      %c0_18 = arith.constant 0 : index
      %c0_19 = arith.constant 0 : index
      %18 = vector.load %arg10[%c0_18, %c0_19] : memref<16x32xf32, #tpu.memory_space<vmem>>, vector<16x32xf32>
      tpu.vector_store %arg10[%c0_18, %c0_19], %17 {strides = array<i32>} : memref<16x32xf32, #tpu.memory_space<vmem>>, vector<16x32xf32>,
      %cst_20 = arith.constant 0.000000e+00 : f32
      %19 = vector.broadcast %cst_20 : f32 to vector<16x32xf32>
      %c0_21 = arith.constant 0 : index
      %c0_22 = arith.constant 0 : index
      %20 = vector.load %arg11[%c0_21, %c0_22] : memref<16x32xf32, #tpu.memory_space<vmem>>, vector<16x32xf32>
      tpu.vector_store %arg11[%c0_21, %c0_22], %19 {strides = array<i32>} : memref<16x32xf32, #tpu.memory_space<vmem>>, vector<16x32xf32>,
    } else {
    }
    %c0 = arith.constant 0 : index
    %c0_1 = arith.constant 0 : index
    %3 = vector.load %arg3[%c0, %c0_1] : memref<16x32xf32, #tpu.memory_space<vmem>>, vector<16x32xf32>
    %c0_2 = arith.constant 0 : index
    %c0_3 = arith.constant 0 : index
    %4 = vector.load %arg10[%c0_2, %c0_3] : memref<16x32xf32, #tpu.memory_space<vmem>>, vector<16x32xf32>
    %c0_4 = arith.constant 0 : index
    %c0_5 = arith.constant 0 : index
    %5 = vector.load %arg4[%c0_4, %c0_5] : memref<32x32xf32, #tpu.memory_space<vmem>>, vector<32x32xf32>
    %cst = arith.constant dense<0.000000e+00> : vector<16x32xf32>
    %6 = tpu.matmul %3, %5, %cst {dimension_numbers = #tpu.dot_dimension_numbers<[1], [0], [0], [1], [0, 0, 1, 1], [], []>} : vector<16x32xf32>, vector<32x32xf32>, vector<16x32xf32> -> vector<16x32xf32>
    %7 = arith.addf %4, %6 : vector<16x32xf32>
    %c0_6 = arith.constant 0 : index
    %c0_7 = arith.constant 0 : index
    %8 = vector.load %arg10[%c0_6, %c0_7] : memref<16x32xf32, #tpu.memory_space<vmem>>, vector<16x32xf32>
    tpu.vector_store %arg10[%c0_6, %c0_7], %7 {strides = array<i32>} : memref<16x32xf32, #tpu.memory_space<vmem>>, vector<16x32xf32>,
    %c0_8 = arith.constant 0 : index
    %c0_9 = arith.constant 0 : index
    %9 = vector.load %arg11[%c0_8, %c0_9] : memref<16x32xf32, #tpu.memory_space<vmem>>, vector<16x32xf32>
    %c0_10 = arith.constant 0 : index
    %c0_11 = arith.constant 0 : index
    %10 = vector.load %arg5[%c0_10, %c0_11] : memref<32x32xf32, #tpu.memory_space<vmem>>, vector<32x32xf32>
    %cst_12 = arith.constant dense<0.000000e+00> : vector<16x32xf32>
    %11 = tpu.matmul %3, %10, %cst_12 {dimension_numbers = #tpu.dot_dimension_numbers<[1], [0], [0], [1], [0, 0, 1, 1], [], []>} : vector<16x32xf32>, vector<32x32xf32>, vector<16x32xf32> -> vector<16x32xf32>
    %12 = arith.addf %9, %11 : vector<16x32xf32>
    %c0_13 = arith.constant 0 : index
    %c0_14 = arith.constant 0 : index
    %13 = vector.load %arg11[%c0_13, %c0_14] : memref<16x32xf32, #tpu.memory_space<vmem>>, vector<16x32xf32>
    tpu.vector_store %arg11[%c0_13, %c0_14], %12 {strides = array<i32>} : memref<16x32xf32, #tpu.memory_space<vmem>>, vector<16x32xf32>,
    %c0_i32_15 = arith.constant 0 : i32
    %14 = arith.cmpi eq, %arg2, %c0_i32_15 : i32
    %15 = arith.extui %14 : i1 to i32
    %c0_i32_16 = arith.constant 0 : i32
    %16 = arith.cmpi ne, %15, %c0_i32_16 : i32
    scf.if %16 {
      %c0_17 = arith.constant 0 : index
      %c0_18 = arith.constant 0 : index
      %17 = vector.load %arg10[%c0_17, %c0_18] : memref<16x32xf32, #tpu.memory_space<vmem>>, vector<16x32xf32>
      %c0_19 = arith.constant 0 : index
      %c0_20 = arith.constant 0 : index
      %18 = vector.load %arg6[%c0_19, %c0_20] : memref<1x32xf32, #tpu.memory_space<vmem>>, vector<1x32xf32>
      %19 = vector.broadcast %18 : vector<1x32xf32> to vector<16x32xf32>
      %20 = arith.addf %17, %19 : vector<16x32xf32>
      %c0_21 = arith.constant 0 : index
      %c0_22 = arith.constant 0 : index
      %21 = vector.load %arg8[%c0_21, %c0_22] : memref<16x32xf32, #tpu.memory_space<vmem>>, vector<16x32xf32>
      tpu.vector_store %arg8[%c0_21, %c0_22], %20 {strides = array<i32>} : memref<16x32xf32, #tpu.memory_space<vmem>>, vector<16x32xf32>,
      %c0_23 = arith.constant 0 : index
      %c0_24 = arith.constant 0 : index
      %22 = vector.load %arg11[%c0_23, %c0_24] : memref<16x32xf32, #tpu.memory_space<vmem>>, vector<16x32xf32>
      %c0_25 = arith.constant 0 : index
      %c0_26 = arith.constant 0 : index
      %23 = vector.load %arg7[%c0_25, %c0_26] : memref<1x32xf32, #tpu.memory_space<vmem>>, vector<1x32xf32>
      %24 = vector.broadcast %23 : vector<1x32xf32> to vector<16x32xf32>
      %25 = arith.addf %22, %24 : vector<16x32xf32>
      %c0_27 = arith.constant 0 : index
      %c0_28 = arith.constant 0 : index
      %26 = vector.load %arg9[%c0_27, %c0_28] : memref<16x32xf32, #tpu.memory_space<vmem>>, vector<16x32xf32>
      tpu.vector_store %arg9[%c0_27, %c0_28], %25 {strides = array<i32>} : memref<16x32xf32, #tpu.memory_space<vmem>>, vector<16x32xf32>,
    } else {
    }
    return
  }
  func.func @transform_0(%arg0: i32, %arg1: i32, %arg2: i32) -> (i32, i32) {
    %c0_i32 = arith.constant 0 : i32
    return %arg0, %arg2 : i32, i32
  }
  func.func @transform_1(%arg0: i32, %arg1: i32, %arg2: i32) -> (i32, i32) {
    %c0_i32 = arith.constant 0 : i32
    return %arg2, %arg1 : i32, i32
  }
  func.func @transform_2(%arg0: i32, %arg1: i32, %arg2: i32) -> (i32, i32) {
    %c0_i32 = arith.constant 0 : i32
    return %arg2, %arg1 : i32, i32
  }
  func.func @transform_3(%arg0: i32, %arg1: i32, %arg2: i32) -> (i32, i32) {
    %c0_i32 = arith.constant 0 : i32
    %c0_i32_0 = arith.constant 0 : i32
    return %c0_i32, %arg1 : i32, i32
  }
  func.func @transform_4(%arg0: i32, %arg1: i32, %arg2: i32) -> (i32, i32) {
    %c0_i32 = arith.constant 0 : i32
    %c0_i32_0 = arith.constant 0 : i32
    return %c0_i32, %arg1 : i32, i32
  }
  func.func @transform_5(%arg0: i32, %arg1: i32, %arg2: i32) -> (i32, i32) {
    %c0_i32 = arith.constant 0 : i32
    return %arg0, %arg1 : i32, i32
  }
  func.func @transform_6(%arg0: i32, %arg1: i32, %arg2: i32) -> (i32, i32) {
    %c0_i32 = arith.constant 0 : i32
    return %arg0, %arg1 : i32, i32
  }
}

module attributes {stable_mosaic.version = 11 : i64} {
  func.func @_attn_kernel(%arg0: i32, %arg1: memref<1x8x32xf32, #tpu.memory_space<vmem>>, %arg2: memref<1x8x32xf32, #tpu.memory_space<vmem>>, %arg3: memref<1x8x32xf32, #tpu.memory_space<vmem>>, %arg4: memref<1x8x32xf32, #tpu.memory_space<vmem>>) attributes {dimension_semantics = [#tpu.dimension_semantics<parallel>], iteration_bounds = array<i64: 2>, scalar_prefetch = 0 : i64, scratch_operands = 0 : i64, tpu.core_type = #tpu.core_type<tc>, window_params = [{transform_indices = @transform_0, window_bounds = array<i64: 1, 8, 32>}, {transform_indices = @transform_1, window_bounds = array<i64: 1, 8, 32>}, {transform_indices = @transform_2, window_bounds = array<i64: 1, 8, 32>}, {transform_indices = @transform_3, window_bounds = array<i64: 1, 8, 32>}]} {
    %c0 = arith.constant 0 : index
    %c0_0 = arith.constant 0 : index
    %c0_1 = arith.constant 0 : index
    %0 = vector.load %arg1[%c0, %c0_0, %c0_1] : memref<1x8x32xf32, #tpu.memory_space<vmem>>, vector<1x8x32xf32>
    %1 = vector.shape_cast %0 : vector<1x8x32xf32> to vector<8x32xf32>
    %c0_2 = arith.constant 0 : index
    %c0_3 = arith.constant 0 : index
    %c0_4 = arith.constant 0 : index
    %2 = vector.load %arg2[%c0_2, %c0_3, %c0_4] : memref<1x8x32xf32, #tpu.memory_space<vmem>>, vector<1x8x32xf32>
    %3 = vector.shape_cast %2 : vector<1x8x32xf32> to vector<8x32xf32>
    %c0_5 = arith.constant 0 : index
    %c0_6 = arith.constant 0 : index
    %c0_7 = arith.constant 0 : index
    %4 = vector.load %arg3[%c0_5, %c0_6, %c0_7] : memref<1x8x32xf32, #tpu.memory_space<vmem>>, vector<1x8x32xf32>
    %5 = vector.shape_cast %4 : vector<1x8x32xf32> to vector<8x32xf32>
    %6 = vector.extract_strided_slice %1 {offsets = [0, 0], sizes = [8, 8], strides = [1, 1]} : vector<8x32xf32> to vector<8x8xf32>
    %7 = vector.extract_strided_slice %3 {offsets = [0, 0], sizes = [8, 8], strides = [1, 1]} : vector<8x32xf32> to vector<8x8xf32>
    %8 = vector.extract_strided_slice %5 {offsets = [0, 0], sizes = [8, 8], strides = [1, 1]} : vector<8x32xf32> to vector<8x8xf32>
    %cst = arith.constant dense<0.000000e+00> : vector<8x8xf32>
    %9 = tpu.matmul %6, %7, %cst {dimension_numbers = #tpu.dot_dimension_numbers<[1], [1], [0], [0], [0, 0, 1, 0], [], []>} : vector<8x8xf32>, vector<8x8xf32>, vector<8x8xf32> -> vector<8x8xf32>
    %cst_8 = arith.constant 0.353553385 : f32
    %10 = vector.broadcast %cst_8 : f32 to vector<8x8xf32>
    %11 = arith.mulf %9, %10 : vector<8x8xf32>
    %cst_9 = arith.constant dense<0xFF800000> : vector<8xf32>
    %12 = vector.multi_reduction <maximumf>, %11, %cst_9 [1] : vector<8x8xf32> to vector<8xf32>
    %13 = vector.shape_cast %12 : vector<8xf32> to vector<8x1xf32>
    %14 = vector.broadcast %13 : vector<8x1xf32> to vector<8x8xf32>
    %15 = arith.subf %11, %14 : vector<8x8xf32>
    %16 = math.exp %15 : vector<8x8xf32>
    %cst_10 = arith.constant dense<0.000000e+00> : vector<8xf32>
    %17 = vector.multi_reduction <add>, %16, %cst_10 [1] : vector<8x8xf32> to vector<8xf32>
    %18 = vector.shape_cast %17 : vector<8xf32> to vector<8x1xf32>
    %19 = tpu.reciprocal %18 {approx = true} : vector<8x1xf32> -> vector<8x1xf32>
    %20 = vector.broadcast %19 : vector<8x1xf32> to vector<8x8xf32>
    %21 = arith.mulf %16, %20 : vector<8x8xf32>
    %cst_11 = arith.constant dense<0.000000e+00> : vector<8x8xf32>
    %22 = tpu.matmul %21, %8, %cst_11 {dimension_numbers = #tpu.dot_dimension_numbers<[1], [0], [0], [1], [0, 0, 1, 1], [], []>} : vector<8x8xf32>, vector<8x8xf32>, vector<8x8xf32> -> vector<8x8xf32>
    %23 = vector.extract_strided_slice %1 {offsets = [0, 8], sizes = [8, 8], strides = [1, 1]} : vector<8x32xf32> to vector<8x8xf32>
    %24 = vector.extract_strided_slice %3 {offsets = [0, 8], sizes = [8, 8], strides = [1, 1]} : vector<8x32xf32> to vector<8x8xf32>
    %25 = vector.extract_strided_slice %5 {offsets = [0, 8], sizes = [8, 8], strides = [1, 1]} : vector<8x32xf32> to vector<8x8xf32>
    %cst_12 = arith.constant dense<0.000000e+00> : vector<8x8xf32>
    %26 = tpu.matmul %23, %24, %cst_12 {dimension_numbers = #tpu.dot_dimension_numbers<[1], [1], [0], [0], [0, 0, 1, 0], [], []>} : vector<8x8xf32>, vector<8x8xf32>, vector<8x8xf32> -> vector<8x8xf32>
    %cst_13 = arith.constant 0.353553385 : f32
    %27 = vector.broadcast %cst_13 : f32 to vector<8x8xf32>
    %28 = arith.mulf %26, %27 : vector<8x8xf32>
    %cst_14 = arith.constant dense<0xFF800000> : vector<8xf32>
    %29 = vector.multi_reduction <maximumf>, %28, %cst_14 [1] : vector<8x8xf32> to vector<8xf32>
    %30 = vector.shape_cast %29 : vector<8xf32> to vector<8x1xf32>
    %31 = vector.broadcast %30 : vector<8x1xf32> to vector<8x8xf32>
    %32 = arith.subf %28, %31 : vector<8x8xf32>
    %33 = math.exp %32 : vector<8x8xf32>
    %cst_15 = arith.constant dense<0.000000e+00> : vector<8xf32>
    %34 = vector.multi_reduction <add>, %33, %cst_15 [1] : vector<8x8xf32> to vector<8xf32>
    %35 = vector.shape_cast %34 : vector<8xf32> to vector<8x1xf32>
    %36 = tpu.reciprocal %35 {approx = true} : vector<8x1xf32> -> vector<8x1xf32>
    %37 = vector.broadcast %36 : vector<8x1xf32> to vector<8x8xf32>
    %38 = arith.mulf %33, %37 : vector<8x8xf32>
    %cst_16 = arith.constant dense<0.000000e+00> : vector<8x8xf32>
    %39 = tpu.matmul %38, %25, %cst_16 {dimension_numbers = #tpu.dot_dimension_numbers<[1], [0], [0], [1], [0, 0, 1, 1], [], []>} : vector<8x8xf32>, vector<8x8xf32>, vector<8x8xf32> -> vector<8x8xf32>
    %40 = vector.extract_strided_slice %1 {offsets = [0, 16], sizes = [8, 8], strides = [1, 1]} : vector<8x32xf32> to vector<8x8xf32>
    %41 = vector.extract_strided_slice %3 {offsets = [0, 16], sizes = [8, 8], strides = [1, 1]} : vector<8x32xf32> to vector<8x8xf32>
    %42 = vector.extract_strided_slice %5 {offsets = [0, 16], sizes = [8, 8], strides = [1, 1]} : vector<8x32xf32> to vector<8x8xf32>
    %cst_17 = arith.constant dense<0.000000e+00> : vector<8x8xf32>
    %43 = tpu.matmul %40, %41, %cst_17 {dimension_numbers = #tpu.dot_dimension_numbers<[1], [1], [0], [0], [0, 0, 1, 0], [], []>} : vector<8x8xf32>, vector<8x8xf32>, vector<8x8xf32> -> vector<8x8xf32>
    %cst_18 = arith.constant 0.353553385 : f32
    %44 = vector.broadcast %cst_18 : f32 to vector<8x8xf32>
    %45 = arith.mulf %43, %44 : vector<8x8xf32>
    %cst_19 = arith.constant dense<0xFF800000> : vector<8xf32>
    %46 = vector.multi_reduction <maximumf>, %45, %cst_19 [1] : vector<8x8xf32> to vector<8xf32>
    %47 = vector.shape_cast %46 : vector<8xf32> to vector<8x1xf32>
    %48 = vector.broadcast %47 : vector<8x1xf32> to vector<8x8xf32>
    %49 = arith.subf %45, %48 : vector<8x8xf32>
    %50 = math.exp %49 : vector<8x8xf32>
    %cst_20 = arith.constant dense<0.000000e+00> : vector<8xf32>
    %51 = vector.multi_reduction <add>, %50, %cst_20 [1] : vector<8x8xf32> to vector<8xf32>
    %52 = vector.shape_cast %51 : vector<8xf32> to vector<8x1xf32>
    %53 = tpu.reciprocal %52 {approx = true} : vector<8x1xf32> -> vector<8x1xf32>
    %54 = vector.broadcast %53 : vector<8x1xf32> to vector<8x8xf32>
    %55 = arith.mulf %50, %54 : vector<8x8xf32>
    %cst_21 = arith.constant dense<0.000000e+00> : vector<8x8xf32>
    %56 = tpu.matmul %55, %42, %cst_21 {dimension_numbers = #tpu.dot_dimension_numbers<[1], [0], [0], [1], [0, 0, 1, 1], [], []>} : vector<8x8xf32>, vector<8x8xf32>, vector<8x8xf32> -> vector<8x8xf32>
    %57 = vector.extract_strided_slice %1 {offsets = [0, 24], sizes = [8, 8], strides = [1, 1]} : vector<8x32xf32> to vector<8x8xf32>
    %58 = vector.extract_strided_slice %3 {offsets = [0, 24], sizes = [8, 8], strides = [1, 1]} : vector<8x32xf32> to vector<8x8xf32>
    %59 = vector.extract_strided_slice %5 {offsets = [0, 24], sizes = [8, 8], strides = [1, 1]} : vector<8x32xf32> to vector<8x8xf32>
    %cst_22 = arith.constant dense<0.000000e+00> : vector<8x8xf32>
    %60 = tpu.matmul %57, %58, %cst_22 {dimension_numbers = #tpu.dot_dimension_numbers<[1], [1], [0], [0], [0, 0, 1, 0], [], []>} : vector<8x8xf32>, vector<8x8xf32>, vector<8x8xf32> -> vector<8x8xf32>
    %cst_23 = arith.constant 0.353553385 : f32
    %61 = vector.broadcast %cst_23 : f32 to vector<8x8xf32>
    %62 = arith.mulf %60, %61 : vector<8x8xf32>
    %cst_24 = arith.constant dense<0xFF800000> : vector<8xf32>
    %63 = vector.multi_reduction <maximumf>, %62, %cst_24 [1] : vector<8x8xf32> to vector<8xf32>
    %64 = vector.shape_cast %63 : vector<8xf32> to vector<8x1xf32>
    %65 = vector.broadcast %64 : vector<8x1xf32> to vector<8x8xf32>
    %66 = arith.subf %62, %65 : vector<8x8xf32>
    %67 = math.exp %66 : vector<8x8xf32>
    %cst_25 = arith.constant dense<0.000000e+00> : vector<8xf32>
    %68 = vector.multi_reduction <add>, %67, %cst_25 [1] : vector<8x8xf32> to vector<8xf32>
    %69 = vector.shape_cast %68 : vector<8xf32> to vector<8x1xf32>
    %70 = tpu.reciprocal %69 {approx = true} : vector<8x1xf32> -> vector<8x1xf32>
    %71 = vector.broadcast %70 : vector<8x1xf32> to vector<8x8xf32>
    %72 = arith.mulf %67, %71 : vector<8x8xf32>
    %cst_26 = arith.constant dense<0.000000e+00> : vector<8x8xf32>
    %73 = tpu.matmul %72, %59, %cst_26 {dimension_numbers = #tpu.dot_dimension_numbers<[1], [0], [0], [1], [0, 0, 1, 1], [], []>} : vector<8x8xf32>, vector<8x8xf32>, vector<8x8xf32> -> vector<8x8xf32>
    %74 = tpu.concatenate %22, %39, %56, %73 in 1 : vector<8x8xf32>, vector<8x8xf32>, vector<8x8xf32>, vector<8x8xf32> -> vector<8x32xf32>
    %c0_27 = arith.constant 0 : index
    %c0_28 = arith.constant 0 : index
    %c0_29 = arith.constant 0 : index
    %75 = vector.load %arg4[%c0_27, %c0_28, %c0_29] : memref<1x8x32xf32, #tpu.memory_space<vmem>>, vector<1x8x32xf32>
    %76 = vector.shape_cast %75 : vector<1x8x32xf32> to vector<8x32xf32>
    %77 = vector.shape_cast %74 : vector<8x32xf32> to vector<1x8x32xf32>
    tpu.vector_store %arg4[%c0_27, %c0_28, %c0_29], %77 {strides = array<i32>} : memref<1x8x32xf32, #tpu.memory_space<vmem>>, vector<1x8x32xf32>,
    return
  }
  func.func @transform_0(%arg0: i32) -> (i32, i32, i32) {
    %c0_i32 = arith.constant 0 : i32
    %c0_i32_0 = arith.constant 0 : i32
    %c0_i32_1 = arith.constant 0 : i32
    return %arg0, %c0_i32, %c0_i32_0 : i32, i32, i32
  }
  func.func @transform_1(%arg0: i32) -> (i32, i32, i32) {
    %c0_i32 = arith.constant 0 : i32
    %c0_i32_0 = arith.constant 0 : i32
    %c0_i32_1 = arith.constant 0 : i32
    return %arg0, %c0_i32, %c0_i32_0 : i32, i32, i32
  }
  func.func @transform_2(%arg0: i32) -> (i32, i32, i32) {
    %c0_i32 = arith.constant 0 : i32
    %c0_i32_0 = arith.constant 0 : i32
    %c0_i32_1 = arith.constant 0 : i32
    return %arg0, %c0_i32, %c0_i32_0 : i32, i32, i32
  }
  func.func @transform_3(%arg0: i32) -> (i32, i32, i32) {
    %c0_i32 = arith.constant 0 : i32
    %c0_i32_0 = arith.constant 0 : i32
    %c0_i32_1 = arith.constant 0 : i32
    return %arg0, %c0_i32, %c0_i32_0 : i32, i32, i32
  }
}

module attributes {stable_mosaic.version = 11 : i64} {
  func.func @_ffn_add_ln_kernel(%arg0: i32, %arg1: i32, %arg2: memref<16x32xf32, #tpu.memory_space<vmem>>, %arg3: memref<32x64xf32, #tpu.memory_space<vmem>>, %arg4: memref<1x64xf32, #tpu.memory_space<vmem>>, %arg5: memref<64x32xf32, #tpu.memory_space<vmem>>, %arg6: memref<1x32xf32, #tpu.memory_space<vmem>>, %arg7: memref<1x32xf32, #tpu.memory_space<vmem>>, %arg8: memref<1x32xf32, #tpu.memory_space<vmem>>, %arg9: memref<16x32xf32, #tpu.memory_space<vmem>>, %arg10: memref<16x32xf32, #tpu.memory_space<vmem>>) attributes {dimension_semantics = [#tpu.dimension_semantics<parallel>, #tpu.dimension_semantics<arbitrary>], iteration_bounds = array<i64: 1, 1>, scalar_prefetch = 0 : i64, scratch_operands = 1 : i64, tpu.core_type = #tpu.core_type<tc>, window_params = [{transform_indices = @transform_0, window_bounds = array<i64: 16, 32>}, {transform_indices = @transform_1, window_bounds = array<i64: 32, 64>}, {transform_indices = @transform_2, window_bounds = array<i64: 1, 64>}, {transform_indices = @transform_3, window_bounds = array<i64: 64, 32>}, {pipeline_mode = #tpu.pipeline_mode<synchronous>, transform_indices = @transform_4, window_bounds = array<i64: 1, 32>}, {pipeline_mode = #tpu.pipeline_mode<synchronous>, transform_indices = @transform_5, window_bounds = array<i64: 1, 32>}, {pipeline_mode = #tpu.pipeline_mode<synchronous>, transform_indices = @transform_6, window_bounds = array<i64: 1, 32>}, {transform_indices = @transform_7, window_bounds = array<i64: 16, 32>}]} {
    %c0_i32 = arith.constant 0 : i32
    %0 = arith.cmpi eq, %arg1, %c0_i32 : i32
    %1 = arith.extui %0 : i1 to i32
    %c0_i32_0 = arith.constant 0 : i32
    %2 = arith.cmpi ne, %1, %c0_i32_0 : i32
    scf.if %2 {
      %cst_16 = arith.constant 0.000000e+00 : f32
      %19 = vector.broadcast %cst_16 : f32 to vector<16x32xf32>
      %c0_17 = arith.constant 0 : index
      %c0_18 = arith.constant 0 : index
      %20 = vector.load %arg10[%c0_17, %c0_18] : memref<16x32xf32, #tpu.memory_space<vmem>>, vector<16x32xf32>
      tpu.vector_store %arg10[%c0_17, %c0_18], %19 {strides = array<i32>} : memref<16x32xf32, #tpu.memory_space<vmem>>, vector<16x32xf32>,
    } else {
    }
    %c0 = arith.constant 0 : index
    %c0_1 = arith.constant 0 : index
    %3 = vector.load %arg2[%c0, %c0_1] : memref<16x32xf32, #tpu.memory_space<vmem>>, vector<16x32xf32>
    %c0_2 = arith.constant 0 : index
    %c0_3 = arith.constant 0 : index
    %4 = vector.load %arg3[%c0_2, %c0_3] : memref<32x64xf32, #tpu.memory_space<vmem>>, vector<32x64xf32>
    %cst = arith.constant dense<0.000000e+00> : vector<16x64xf32>
    %5 = tpu.matmul %3, %4, %cst {dimension_numbers = #tpu.dot_dimension_numbers<[1], [0], [0], [1], [0, 0, 1, 1], [], []>} : vector<16x32xf32>, vector<32x64xf32>, vector<16x64xf32> -> vector<16x64xf32>
    %c0_4 = arith.constant 0 : index
    %c0_5 = arith.constant 0 : index
    %6 = vector.load %arg4[%c0_4, %c0_5] : memref<1x64xf32, #tpu.memory_space<vmem>>, vector<1x64xf32>
    %7 = vector.broadcast %6 : vector<1x64xf32> to vector<16x64xf32>
    %8 = arith.addf %5, %7 : vector<16x64xf32>
    %cst_6 = arith.constant 0.000000e+00 : f32
    %9 = vector.broadcast %cst_6 : f32 to vector<16x64xf32>
    %10 = arith.maximumf %8, %9 : vector<16x64xf32>
    %c0_7 = arith.constant 0 : index
    %c0_8 = arith.constant 0 : index
    %11 = vector.load %arg10[%c0_7, %c0_8] : memref<16x32xf32, #tpu.memory_space<vmem>>, vector<16x32xf32>
    %c0_9 = arith.constant 0 : index
    %c0_10 = arith.constant 0 : index
    %12 = vector.load %arg5[%c0_9, %c0_10] : memref<64x32xf32, #tpu.memory_space<vmem>>, vector<64x32xf32>
    %cst_11 = arith.constant dense<0.000000e+00> : vector<16x32xf32>
    %13 = tpu.matmul %10, %12, %cst_11 {dimension_numbers = #tpu.dot_dimension_numbers<[1], [0], [0], [1], [0, 0, 1, 1], [], []>} : vector<16x64xf32>, vector<64x32xf32>, vector<16x32xf32> -> vector<16x32xf32>
    %14 = arith.addf %11, %13 : vector<16x32xf32>
    %c0_12 = arith.constant 0 : index
    %c0_13 = arith.constant 0 : index
    %15 = vector.load %arg10[%c0_12, %c0_13] : memref<16x32xf32, #tpu.memory_space<vmem>>, vector<16x32xf32>
    tpu.vector_store %arg10[%c0_12, %c0_13], %14 {strides = array<i32>} : memref<16x32xf32, #tpu.memory_space<vmem>>, vector<16x32xf32>,
    %c0_i32_14 = arith.constant 0 : i32
    %16 = arith.cmpi eq, %arg1, %c0_i32_14 : i32
    %17 = arith.extui %16 : i1 to i32
    %c0_i32_15 = arith.constant 0 : i32
    %18 = arith.cmpi ne, %17, %c0_i32_15 : i32
    scf.if %18 {
      %c0_16 = arith.constant 0 : index
      %c0_17 = arith.constant 0 : index
      %19 = vector.load %arg10[%c0_16, %c0_17] : memref<16x32xf32, #tpu.memory_space<vmem>>, vector<16x32xf32>
      %c0_18 = arith.constant 0 : index
      %c0_19 = arith.constant 0 : index
      %20 = vector.load %arg6[%c0_18, %c0_19] : memref<1x32xf32, #tpu.memory_space<vmem>>, vector<1x32xf32>
      %21 = vector.broadcast %20 : vector<1x32xf32> to vector<16x32xf32>
      %22 = arith.addf %19, %21 : vector<16x32xf32>
      %c0_20 = arith.constant 0 : index
      %c0_21 = arith.constant 0 : index
      %23 = vector.load %arg2[%c0_20, %c0_21] : memref<16x32xf32, #tpu.memory_space<vmem>>, vector<16x32xf32>
      %24 = arith.addf %22, %23 : vector<16x32xf32>
      %cst_22 = arith.constant dense<0.000000e+00> : vector<16xf32>
      %25 = vector.multi_reduction <add>, %24, %cst_22 [1] : vector<16x32xf32> to vector<16xf32>
      %26 = vector.shape_cast %25 : vector<16xf32> to vector<16x1xf32>
      %cst_23 = arith.constant 3.200000e+01 : f32
      %27 = vector.broadcast %cst_23 : f32 to vector<16x1xf32>
      %28 = arith.divf %26, %27 : vector<16x1xf32>
      %29 = vector.broadcast %28 : vector<16x1xf32> to vector<16x32xf32>
      %30 = arith.subf %24, %29 : vector<16x32xf32>
      %31 = arith.mulf %30, %30 : vector<16x32xf32>
      %cst_24 = arith.constant dense<0.000000e+00> : vector<16xf32>
      %32 = vector.multi_reduction <add>, %31, %cst_24 [1] : vector<16x32xf32> to vector<16xf32>
      %33 = vector.shape_cast %32 : vector<16xf32> to vector<16x1xf32>
      %cst_25 = arith.constant 3.200000e+01 : f32
      %34 = vector.broadcast %cst_25 : f32 to vector<16x1xf32>
      %35 = arith.divf %33, %34 : vector<16x1xf32>
      %36 = vector.broadcast %28 : vector<16x1xf32> to vector<16x32xf32>
      %37 = arith.subf %24, %36 : vector<16x32xf32>
      %cst_26 = arith.constant 9.99999974E-6 : f32
      %38 = vector.broadcast %cst_26 : f32 to vector<16x1xf32>
      %39 = arith.addf %35, %38 : vector<16x1xf32>
      %40 = math.rsqrt %39 : vector<16x1xf32>
      %41 = vector.broadcast %40 : vector<16x1xf32> to vector<16x32xf32>
      %42 = arith.mulf %37, %41 : vector<16x32xf32>
      %c0_27 = arith.constant 0 : index
      %c0_28 = arith.constant 0 : index
      %43 = vector.load %arg7[%c0_27, %c0_28] : memref<1x32xf32, #tpu.memory_space<vmem>>, vector<1x32xf32>
      %44 = vector.broadcast %43 : vector<1x32xf32> to vector<16x32xf32>
      %45 = arith.mulf %42, %44 : vector<16x32xf32>
      %c0_29 = arith.constant 0 : index
      %c0_30 = arith.constant 0 : index
      %46 = vector.load %arg8[%c0_29, %c0_30] : memref<1x32xf32, #tpu.memory_space<vmem>>, vector<1x32xf32>
      %47 = vector.broadcast %46 : vector<1x32xf32> to vector<16x32xf32>
      %48 = arith.addf %45, %47 : vector<16x32xf32>
      %c0_31 = arith.constant 0 : index
      %c0_32 = arith.constant 0 : index
      %49 = vector.load %arg9[%c0_31, %c0_32] : memref<16x32xf32, #tpu.memory_space<vmem>>, vector<16x32xf32>
      tpu.vector_store %arg9[%c0_31, %c0_32], %48 {strides = array<i32>} : memref<16x32xf32, #tpu.memory_space<vmem>>, vector<16x32xf32>,
    } else {
    }
    return
  }
  func.func @transform_0(%arg0: i32, %arg1: i32) -> (i32, i32) {
    %c0_i32 = arith.constant 0 : i32
    %c0_i32_0 = arith.constant 0 : i32
    return %arg0, %c0_i32 : i32, i32
  }
  func.func @transform_1(%arg0: i32, %arg1: i32) -> (i32, i32) {
    %c0_i32 = arith.constant 0 : i32
    %c0_i32_0 = arith.constant 0 : i32
    return %c0_i32, %arg1 : i32, i32
  }
  func.func @transform_2(%arg0: i32, %arg1: i32) -> (i32, i32) {
    %c0_i32 = arith.constant 0 : i32
    %c0_i32_0 = arith.constant 0 : i32
    return %c0_i32, %arg1 : i32, i32
  }
  func.func @transform_3(%arg0: i32, %arg1: i32) -> (i32, i32) {
    %c0_i32 = arith.constant 0 : i32
    %c0_i32_0 = arith.constant 0 : i32
    return %arg1, %c0_i32 : i32, i32
  }
  func.func @transform_4(%arg0: i32, %arg1: i32) -> (i32, i32) {
    %c0_i32 = arith.constant 0 : i32
    %c0_i32_0 = arith.constant 0 : i32
    %c0_i32_1 = arith.constant 0 : i32
    return %c0_i32, %c0_i32_0 : i32, i32
  }
  func.func @transform_5(%arg0: i32, %arg1: i32) -> (i32, i32) {
    %c0_i32 = arith.constant 0 : i32
    %c0_i32_0 = arith.constant 0 : i32
    %c0_i32_1 = arith.constant 0 : i32
    return %c0_i32, %c0_i32_0 : i32, i32
  }
  func.func @transform_6(%arg0: i32, %arg1: i32) -> (i32, i32) {
    %c0_i32 = arith.constant 0 : i32
    %c0_i32_0 = arith.constant 0 : i32
    %c0_i32_1 = arith.constant 0 : i32
    return %c0_i32, %c0_i32_0 : i32, i32
  }
  func.func @transform_7(%arg0: i32, %arg1: i32) -> (i32, i32) {
    %c0_i32 = arith.constant 0 : i32
    %c0_i32_0 = arith.constant 0 : i32
    return %arg0, %c0_i32 : i32, i32
  }
}

module attributes {stable_mosaic.version = 11 : i64} {
  func.func @_ffn_add_ln_kernel(%arg0: i32, %arg1: i32, %arg2: memref<16x32xf32, #tpu.memory_space<vmem>>, %arg3: memref<32x64xf32, #tpu.memory_space<vmem>>, %arg4: memref<1x64xf32, #tpu.memory_space<vmem>>, %arg5: memref<64x32xf32, #tpu.memory_space<vmem>>, %arg6: memref<1x32xf32, #tpu.memory_space<vmem>>, %arg7: memref<1x32xf32, #tpu.memory_space<vmem>>, %arg8: memref<1x32xf32, #tpu.memory_space<vmem>>, %arg9: memref<16x32xf32, #tpu.memory_space<vmem>>, %arg10: memref<16x32xf32, #tpu.memory_space<vmem>>) attributes {dimension_semantics = [#tpu.dimension_semantics<parallel>, #tpu.dimension_semantics<arbitrary>], iteration_bounds = array<i64: 1, 1>, scalar_prefetch = 0 : i64, scratch_operands = 1 : i64, tpu.core_type = #tpu.core_type<tc>, window_params = [{transform_indices = @transform_0, window_bounds = array<i64: 16, 32>}, {transform_indices = @transform_1, window_bounds = array<i64: 32, 64>}, {transform_indices = @transform_2, window_bounds = array<i64: 1, 64>}, {transform_indices = @transform_3, window_bounds = array<i64: 64, 32>}, {pipeline_mode = #tpu.pipeline_mode<synchronous>, transform_indices = @transform_4, window_bounds = array<i64: 1, 32>}, {pipeline_mode = #tpu.pipeline_mode<synchronous>, transform_indices = @transform_5, window_bounds = array<i64: 1, 32>}, {pipeline_mode = #tpu.pipeline_mode<synchronous>, transform_indices = @transform_6, window_bounds = array<i64: 1, 32>}, {transform_indices = @transform_7, window_bounds = array<i64: 16, 32>}]} {
    %c0_i32 = arith.constant 0 : i32
    %0 = arith.cmpi eq, %arg1, %c0_i32 : i32
    %1 = arith.extui %0 : i1 to i32
    %c0_i32_0 = arith.constant 0 : i32
    %2 = arith.cmpi ne, %1, %c0_i32_0 : i32
    scf.if %2 {
      %cst_16 = arith.constant 0.000000e+00 : f32
      %19 = vector.broadcast %cst_16 : f32 to vector<16x32xf32>
      %c0_17 = arith.constant 0 : index
      %c0_18 = arith.constant 0 : index
      %20 = vector.load %arg10[%c0_17, %c0_18] : memref<16x32xf32, #tpu.memory_space<vmem>>, vector<16x32xf32>
      tpu.vector_store %arg10[%c0_17, %c0_18], %19 {strides = array<i32>} : memref<16x32xf32, #tpu.memory_space<vmem>>, vector<16x32xf32>,
    } else {
    }
    %c0 = arith.constant 0 : index
    %c0_1 = arith.constant 0 : index
    %3 = vector.load %arg2[%c0, %c0_1] : memref<16x32xf32, #tpu.memory_space<vmem>>, vector<16x32xf32>
    %c0_2 = arith.constant 0 : index
    %c0_3 = arith.constant 0 : index
    %4 = vector.load %arg3[%c0_2, %c0_3] : memref<32x64xf32, #tpu.memory_space<vmem>>, vector<32x64xf32>
    %cst = arith.constant dense<0.000000e+00> : vector<16x64xf32>
    %5 = tpu.matmul %3, %4, %cst {dimension_numbers = #tpu.dot_dimension_numbers<[1], [0], [0], [1], [0, 0, 1, 1], [], []>} : vector<16x32xf32>, vector<32x64xf32>, vector<16x64xf32> -> vector<16x64xf32>
    %c0_4 = arith.constant 0 : index
    %c0_5 = arith.constant 0 : index
    %6 = vector.load %arg4[%c0_4, %c0_5] : memref<1x64xf32, #tpu.memory_space<vmem>>, vector<1x64xf32>
    %7 = vector.broadcast %6 : vector<1x64xf32> to vector<16x64xf32>
    %8 = arith.addf %5, %7 : vector<16x64xf32>
    %cst_6 = arith.constant 0.000000e+00 : f32
    %9 = vector.broadcast %cst_6 : f32 to vector<16x64xf32>
    %10 = arith.maximumf %8, %9 : vector<16x64xf32>
    %c0_7 = arith.constant 0 : index
    %c0_8 = arith.constant 0 : index
    %11 = vector.load %arg10[%c0_7, %c0_8] : memref<16x32xf32, #tpu.memory_space<vmem>>, vector<16x32xf32>
    %c0_9 = arith.constant 0 : index
    %c0_10 = arith.constant 0 : index
    %12 = vector.load %arg5[%c0_9, %c0_10] : memref<64x32xf32, #tpu.memory_space<vmem>>, vector<64x32xf32>
    %cst_11 = arith.constant dense<0.000000e+00> : vector<16x32xf32>
    %13 = tpu.matmul %10, %12, %cst_11 {dimension_numbers = #tpu.dot_dimension_numbers<[1], [0], [0], [1], [0, 0, 1, 1], [], []>} : vector<16x64xf32>, vector<64x32xf32>, vector<16x32xf32> -> vector<16x32xf32>
    %14 = arith.addf %11, %13 : vector<16x32xf32>
    %c0_12 = arith.constant 0 : index
    %c0_13 = arith.constant 0 : index
    %15 = vector.load %arg10[%c0_12, %c0_13] : memref<16x32xf32, #tpu.memory_space<vmem>>, vector<16x32xf32>
    tpu.vector_store %arg10[%c0_12, %c0_13], %14 {strides = array<i32>} : memref<16x32xf32, #tpu.memory_space<vmem>>, vector<16x32xf32>,
    %c0_i32_14 = arith.constant 0 : i32
    %16 = arith.cmpi eq, %arg1, %c0_i32_14 : i32
    %17 = arith.extui %16 : i1 to i32
    %c0_i32_15 = arith.constant 0 : i32
    %18 = arith.cmpi ne, %17, %c0_i32_15 : i32
    scf.if %18 {
      %c0_16 = arith.constant 0 : index
      %c0_17 = arith.constant 0 : index
      %19 = vector.load %arg10[%c0_16, %c0_17] : memref<16x32xf32, #tpu.memory_space<vmem>>, vector<16x32xf32>
      %c0_18 = arith.constant 0 : index
      %c0_19 = arith.constant 0 : index
      %20 = vector.load %arg6[%c0_18, %c0_19] : memref<1x32xf32, #tpu.memory_space<vmem>>, vector<1x32xf32>
      %21 = vector.broadcast %20 : vector<1x32xf32> to vector<16x32xf32>
      %22 = arith.addf %19, %21 : vector<16x32xf32>
      %c0_20 = arith.constant 0 : index
      %c0_21 = arith.constant 0 : index
      %23 = vector.load %arg2[%c0_20, %c0_21] : memref<16x32xf32, #tpu.memory_space<vmem>>, vector<16x32xf32>
      %24 = arith.addf %22, %23 : vector<16x32xf32>
      %cst_22 = arith.constant dense<0.000000e+00> : vector<16xf32>
      %25 = vector.multi_reduction <add>, %24, %cst_22 [1] : vector<16x32xf32> to vector<16xf32>
      %26 = vector.shape_cast %25 : vector<16xf32> to vector<16x1xf32>
      %cst_23 = arith.constant 3.200000e+01 : f32
      %27 = vector.broadcast %cst_23 : f32 to vector<16x1xf32>
      %28 = arith.divf %26, %27 : vector<16x1xf32>
      %29 = vector.broadcast %28 : vector<16x1xf32> to vector<16x32xf32>
      %30 = arith.subf %24, %29 : vector<16x32xf32>
      %31 = arith.mulf %30, %30 : vector<16x32xf32>
      %cst_24 = arith.constant dense<0.000000e+00> : vector<16xf32>
      %32 = vector.multi_reduction <add>, %31, %cst_24 [1] : vector<16x32xf32> to vector<16xf32>
      %33 = vector.shape_cast %32 : vector<16xf32> to vector<16x1xf32>
      %cst_25 = arith.constant 3.200000e+01 : f32
      %34 = vector.broadcast %cst_25 : f32 to vector<16x1xf32>
      %35 = arith.divf %33, %34 : vector<16x1xf32>
      %36 = vector.broadcast %28 : vector<16x1xf32> to vector<16x32xf32>
      %37 = arith.subf %24, %36 : vector<16x32xf32>
      %cst_26 = arith.constant 9.99999974E-6 : f32
      %38 = vector.broadcast %cst_26 : f32 to vector<16x1xf32>
      %39 = arith.addf %35, %38 : vector<16x1xf32>
      %40 = math.rsqrt %39 : vector<16x1xf32>
      %41 = vector.broadcast %40 : vector<16x1xf32> to vector<16x32xf32>
      %42 = arith.mulf %37, %41 : vector<16x32xf32>
      %c0_27 = arith.constant 0 : index
      %c0_28 = arith.constant 0 : index
      %43 = vector.load %arg7[%c0_27, %c0_28] : memref<1x32xf32, #tpu.memory_space<vmem>>, vector<1x32xf32>
      %44 = vector.broadcast %43 : vector<1x32xf32> to vector<16x32xf32>
      %45 = arith.mulf %42, %44 : vector<16x32xf32>
      %c0_29 = arith.constant 0 : index
      %c0_30 = arith.constant 0 : index
      %46 = vector.load %arg8[%c0_29, %c0_30] : memref<1x32xf32, #tpu.memory_space<vmem>>, vector<1x32xf32>
      %47 = vector.broadcast %46 : vector<1x32xf32> to vector<16x32xf32>
      %48 = arith.addf %45, %47 : vector<16x32xf32>
      %c0_31 = arith.constant 0 : index
      %c0_32 = arith.constant 0 : index
      %49 = vector.load %arg9[%c0_31, %c0_32] : memref<16x32xf32, #tpu.memory_space<vmem>>, vector<16x32xf32>
      tpu.vector_store %arg9[%c0_31, %c0_32], %48 {strides = array<i32>} : memref<16x32xf32, #tpu.memory_space<vmem>>, vector<16x32xf32>,
    } else {
    }
    return
  }
  func.func @transform_0(%arg0: i32, %arg1: i32) -> (i32, i32) {
    %c0_i32 = arith.constant 0 : i32
    %c0_i32_0 = arith.constant 0 : i32
    return %arg0, %c0_i32 : i32, i32
  }
  func.func @transform_1(%arg0: i32, %arg1: i32) -> (i32, i32) {
    %c0_i32 = arith.constant 0 : i32
    %c0_i32_0 = arith.constant 0 : i32
    return %c0_i32, %arg1 : i32, i32
  }
  func.func @transform_2(%arg0: i32, %arg1: i32) -> (i32, i32) {
    %c0_i32 = arith.constant 0 : i32
    %c0_i32_0 = arith.constant 0 : i32
    return %c0_i32, %arg1 : i32, i32
  }
  func.func @transform_3(%arg0: i32, %arg1: i32) -> (i32, i32) {
    %c0_i32 = arith.constant 0 : i32
    %c0_i32_0 = arith.constant 0 : i32
    return %arg1, %c0_i32 : i32, i32
  }
  func.func @transform_4(%arg0: i32, %arg1: i32) -> (i32, i32) {
    %c0_i32 = arith.constant 0 : i32
    %c0_i32_0 = arith.constant 0 : i32
    %c0_i32_1 = arith.constant 0 : i32
    return %c0_i32, %c0_i32_0 : i32, i32
  }
  func.func @transform_5(%arg0: i32, %arg1: i32) -> (i32, i32) {
    %c0_i32 = arith.constant 0 : i32
    %c0_i32_0 = arith.constant 0 : i32
    %c0_i32_1 = arith.constant 0 : i32
    return %c0_i32, %c0_i32_0 : i32, i32
  }
  func.func @transform_6(%arg0: i32, %arg1: i32) -> (i32, i32) {
    %c0_i32 = arith.constant 0 : i32
    %c0_i32_0 = arith.constant 0 : i32
    %c0_i32_1 = arith.constant 0 : i32
    return %c0_i32, %c0_i32_0 : i32, i32
  }
  func.func @transform_7(%arg0: i32, %arg1: i32) -> (i32, i32) {
    %c0_i32 = arith.constant 0 : i32
    %c0_i32_0 = arith.constant 0 : i32
    return %arg0, %c0_i32 : i32, i32
  }
}

</mosaic_0001>

<bundles_post_ra>
// kernel: _lambda_.18
= control target key start
LH: loop header
LB: loop body
LE: loop exit
PB: predicated region body
PF: predicated region fallthrough
CT: control target
= control target key end

     0   :  { %vm27_vm0 = vcmask 261120   ;;  %v228_v3 = vmov 0.0   ;;  %s315_s1 = inlined_call_operand.vmem [shape: f32[32,32], index: 1, kind: input, shape index: {}]   ;;  %s316_s0 = inlined_call_operand.vmem [shape: f32[16,32], index: 0, kind: input, shape index: {}]   ;;  %s317_s2 = inlined_call_operand.vmem [shape: f32[1,32], index: 2, kind: input, shape index: {}]   ;;  %s318_s3 = inlined_call_operand.vmem [shape: f32[16,32], index: 3, kind: input, shape index: {}]   ;;  %s319_s4 = inlined_call_operand.vmem [shape: f32[1,32], index: 4, kind: input, shape index: {}]   ;;  %s320_s5 = inlined_call_operand.vmem [shape: f32[1,32], index: 5, kind: input, shape index: {}]   ;;  %s321_s6 = inlined_call_operand.vmem [shape: f32[16,32], index: 6, kind: output, shape index: {}]  }
   0x1   :  { %v34_v0 = vld [vmem:[%s315_s1] sm:$0xff]  ;;  %v35_v1 = vld [vmem:[%s315_s1 + $0x8] sm:$0xff]  ;;  %v36_v2 = vld [vmem:[%s315_s1 + $0x10] sm:$0xff]  ;;  %29 = vst.msk [vmem:[#allocation2 + $0x8] sm:$0xff] %vm27_vm0, %v228_v3 }
   0x2   :  { %28 = vst.msk [vmem:[#allocation2] sm:$0xff] %vm27_vm0, %v228_v3  ;;  %v215_v4 = vpack.c.bf16 %v35_v1, %v34_v0  ;;  %v37_v5 = vld [vmem:[%s315_s1 + $0x18] sm:$0xff]  ;;  %v32_v6 = vld [vmem:[%s316_s0] sm:$0xff]  ;;  %v33_v8 = vld [vmem:[%s316_s0 + $0x8] sm:$0xff] }
   0x3   :  { %v219_v7 = vpack.c.bf16 %v37_v5, %v36_v2  ;;  %212 = vmatprep.mubr.msk.f32.mxu0 %vm27_vm0, %v32_v6  ;;  %v195_v15 = vld [vmem:[%s317_s2] ss:$0 sm:$0xff]  ;;  %v139_v21 = vld [vmem:[%s318_s3 + $0x8] sm:$0xff] }
   0x4   :  { %216 = vmatprep.subr.bf16.mxu0 %v215_v4  ;;  %v138_v18 = vld [vmem:[%s318_s3] sm:$0xff] }
   0x5   :  { %218 = vmatpush3.bf16.msra.mxu0 %v215_v4  ;;  %v196_v43 = vld [vmem:[%s319_s4] ss:$0 sm:$0xff] }
   0x6   :  { %220 = vmatprep.subr.bf16.mxu0 %v219_v7  ;;  %v197_v45 = vld [vmem:[%s320_s5] ss:$0 sm:$0xff] }
   0x8   :  { %v31_v9 = vld [vmem:[#allocation2 + $0x8] sm:$0xff] }
   0x9   :  { %222 = vmatpush3.bf16.msra.mxu0 %v219_v7  ;;  %v30_v10 = vld [vmem:[#allocation2] sm:$0xff] }
   0xc   :  { %213 = vmatmul.mubr.msk.f32.vlgmr.msra.gmra.mrb[0].mxu0 %vm27_vm0, %v33_v8 }
  0xdf   :  { %v214_v11 = vpop.f32.mrb[0].mxu0 }
  0xe0   :  { %v121_v12 = vadd.f32 %v214_v11, %v31_v9  ;;  %v111_v13 = vpop.f32.mrb[1].mxu0 }
  0xe1   :  { %v120_v14 = vadd.f32 %v111_v13, %v30_v10 }
  0xe2   :  { %123 = vst.msk [vmem:[#allocation2 + $0x8] sm:$0xff] %vm27_vm0, %v121_v12 }
  0xe3   :  { %122 = vst.msk [vmem:[#allocation2] sm:$0xff] %vm27_vm0, %v120_v14 }
  0xe9   :  { %v128_v16 = vld [vmem:[#allocation2 + $0x8] sm:$0xff] }
  0xea   :  { %v127_v17 = vld [vmem:[#allocation2] sm:$0xff]  ;;  %v137_v20 = vadd.f32 %v195_v15, %v128_v16 }
  0xeb   :  { %v136_v19 = vadd.f32 %v195_v15, %v127_v17 }
  0xec   :  { %v141_v24 = vadd.f32 %v139_v21, %v137_v20 }
  0xed   :  { %v140_v22 = vadd.f32 %v138_v18, %v136_v19 }
  0xee   :  { %v145_v25 = vsel %vm27_vm0, %v141_v24, 0.0 }
  0xef   :  { %v142_v23 = vsel %vm27_vm0, %v140_v22, 0.0 }
  0xf0   :  { %143 = vadd.xlane.f32.xlu0 %v142_v23 }
  0xf4   :  { %146 = vadd.xlane.f32.xlu0 %v145_v25 }
 0x17d   :  { %v144_v26 = vpop.xlane.xlu0 %143 }
 0x17e   :  { %v149_v27 = vmul.f32 0.03125, %v144_v26 }
 0x180   :  { %v151_v28 = vsub.f32 %v140_v22, %v149_v27 }
 0x181   :  { %v147_v29 = vpop.xlane.xlu0 %146 }
 0x182   :  { %v150_v30 = vmul.f32 0.03125, %v147_v29  ;;  %v153_v31 = vmul.f32 %v151_v28, %v151_v28 }
 0x184   :  { %v152_v32 = vsub.f32 %v141_v24, %v150_v30  ;;  %v155_v33 = vsel %vm27_vm0, %v153_v31, 0.0 }
 0x185   :  { %156 = vadd.xlane.f32.xlu1 %v155_v33 }
 0x186   :  { %v154_v34 = vmul.f32 %v152_v32, %v152_v32 }
 0x188   :  { %v158_v35 = vsel %vm27_vm0, %v154_v34, 0.0 }
 0x189   :  { %159 = vadd.xlane.f32.xlu1 %v158_v35 }
 0x212   :  { %v157_v36 = vpop.xlane.xlu1 %156 }
 0x213   :  { %v161_v37 = vmul.f32 0.03125, %v157_v36 }
 0x215   :  { %v163_v38 = vadd.f32 1e-05, %v161_v37 }
 0x216   :  { %v160_v39 = vpop.xlane.xlu1 %159 }
 0x217   :  { %224 = vrsqrt.f32 %v163_v38  ;;  %v162_v40 = vmul.f32 0.03125, %v160_v39 }
 0x219   :  { %v164_v41 = vadd.f32 1e-05, %v162_v40 }
 0x21b   :  { %226 = vrsqrt.f32 %v164_v41 }
 0x221   :  { %v225_v42 = vpop.eup %224 }
 0x222   :  { %v167_v44 = vmul.f32 %v225_v42, %v151_v28 }
 0x224   :  { %v176_v46 = vmul.f32 %v196_v43, %v167_v44 }
 0x225   :  { %v227_v47 = vpop.eup %226 }
 0x226   :  { %v185_v48 = vadd.f32 %v197_v45, %v176_v46  ;;  %v168_v49 = vmul.f32 %v227_v47, %v152_v32 }
 0x228   :  { %187 = vst.msk [vmem:[%s321_s6] sm:$0xff] %vm27_vm0, %v185_v48  ;;  %v177_v50 = vmul.f32 %v196_v43, %v168_v49 }
 0x22a   :  { %v186_v51 = vadd.f32 %v197_v45, %v177_v50 }
 0x22c   :  { %188 = vst.msk [vmem:[%s321_s6 + $0x8] sm:$0xff] %vm27_vm0, %v186_v51 }

// kernel: _lambda_.19
= control target key start
LH: loop header
LB: loop body
LE: loop exit
PB: predicated region body
PF: predicated region fallthrough
CT: control target
= control target key end

     0   :  { %vm18_vm0 = vcmask 261120   ;;  %v164_v3 = vmov 0.0   ;;  %s220_s1 = inlined_call_operand.vmem [shape: f32[32,32], index: 1, kind: input, shape index: {}]   ;;  %s221_s0 = inlined_call_operand.vmem [shape: f32[16,32], index: 0, kind: input, shape index: {}]   ;;  %s222_s2 = inlined_call_operand.vmem [shape: f32[1,32], index: 2, kind: input, shape index: {}]   ;;  %s223_s3 = inlined_call_operand.vmem [shape: f32[16,32], index: 3, kind: output, shape index: {}]  }
   0x1   :  { %v25_v0 = vld [vmem:[%s220_s1] sm:$0xff]  ;;  %v26_v1 = vld [vmem:[%s220_s1 + $0x8] sm:$0xff]  ;;  %v27_v2 = vld [vmem:[%s220_s1 + $0x10] sm:$0xff]  ;;  %20 = vst.msk [vmem:[#allocation2 + $0x8] sm:$0xff] %vm18_vm0, %v164_v3 }
   0x2   :  { %19 = vst.msk [vmem:[#allocation2] sm:$0xff] %vm18_vm0, %v164_v3  ;;  %v155_v4 = vpack.c.bf16 %v26_v1, %v25_v0  ;;  %v28_v5 = vld [vmem:[%s220_s1 + $0x18] sm:$0xff]  ;;  %v21_v6 = vld [vmem:[%s221_s0] sm:$0xff]  ;;  %v22_v8 = vld [vmem:[%s221_s0 + $0x8] sm:$0xff] }
   0x3   :  { %v159_v7 = vpack.c.bf16 %v28_v5, %v27_v2  ;;  %152 = vmatprep.mubr.msk.f32.mxu0 %vm18_vm0, %v21_v6  ;;  %v137_v15 = vld [vmem:[%s222_s2] ss:$0 sm:$0xff] }
   0x4   :  { %156 = vmatprep.subr.bf16.mxu0 %v155_v4 }
   0x5   :  { %158 = vmatpush3.bf16.msra.mxu0 %v155_v4 }
   0x6   :  { %160 = vmatprep.subr.bf16.mxu0 %v159_v7 }
   0x8   :  { %v24_v9 = vld [vmem:[#allocation2 + $0x8] sm:$0xff] }
   0x9   :  { %162 = vmatpush3.bf16.msra.mxu0 %v159_v7  ;;  %v23_v10 = vld [vmem:[#allocation2] sm:$0xff] }
   0xc   :  { %153 = vmatmul.mubr.msk.f32.vlgmr.msra.gmra.mrb[0].mxu0 %vm18_vm0, %v22_v8 }
  0xdf   :  { %v154_v11 = vpop.f32.mrb[0].mxu0 }
  0xe0   :  { %v112_v12 = vadd.f32 %v154_v11, %v24_v9  ;;  %v102_v13 = vpop.f32.mrb[1].mxu0 }
  0xe1   :  { %v111_v14 = vadd.f32 %v102_v13, %v23_v10 }
  0xe2   :  { %114 = vst.msk [vmem:[#allocation2 + $0x8] sm:$0xff] %vm18_vm0, %v112_v12 }
  0xe3   :  { %113 = vst.msk [vmem:[#allocation2] sm:$0xff] %vm18_vm0, %v111_v14 }
  0xe9   :  { %v119_v16 = vld [vmem:[#allocation2 + $0x8] sm:$0xff] }
  0xea   :  { %v128_v17 = vadd.f32 %v137_v15, %v119_v16  ;;  %v118_v18 = vld [vmem:[#allocation2] sm:$0xff] }
  0xeb   :  { %v127_v19 = vadd.f32 %v137_v15, %v118_v18 }
  0xec   :  { %130 = vst.msk [vmem:[%s223_s3 + $0x8] sm:$0xff] %vm18_vm0, %v128_v17 }
  0xed   :  { %129 = vst.msk [vmem:[%s223_s3] sm:$0xff] %vm18_vm0, %v127_v19 }

// kernel: _lambda_.16
= control target key start
LH: loop header
LB: loop body
LE: loop exit
PB: predicated region body
PF: predicated region fallthrough
CT: control target
= control target key end

     0   :  { %vm33_vm0 = vcmask 261120   ;;  %v443_v3 = vmov 0.0   ;;  %s587_s1 = inlined_call_operand.vmem [shape: f32[32,32], index: 1, kind: input, shape index: {}]   ;;  %s588_s0 = inlined_call_operand.vmem [shape: f32[16,32], index: 0, kind: input, shape index: {}]   ;;  %s589_s2 = inlined_call_operand.vmem [shape: f32[32,32], index: 2, kind: input, shape index: {}]   ;;  %s590_s3 = inlined_call_operand.vmem [shape: f32[32,32], index: 3, kind: input, shape index: {}]   ;;  %s591_s4 = inlined_call_operand.vmem [shape: f32[1,32], index: 4, kind: input, shape index: {}]   ;;  %s592_s5 = inlined_call_operand.vmem [shape: f32[1,32], index: 5, kind: input, shape index: {}]   ;;  %s593_s7 = inlined_call_operand.vmem [shape: f32[16,32], index: 7, kind: output, shape index: {0}]   ;;  %s594_s8 = inlined_call_operand.vmem [shape: f32[16,32], index: 8, kind: output, shape index: {1}]   ;;  %s595_s6 = inlined_call_operand.vmem [shape: f32[1,32], index: 6, kind: input, shape index: {}]   ;;  %s596_s9 = inlined_call_operand.vmem [shape: f32[16,32], index: 9, kind: output, shape index: {2}]  }
   0x1   :  { %v44_v0 = vld [vmem:[%s587_s1] sm:$0xff]  ;;  %v45_v1 = vld [vmem:[%s587_s1 + $0x8] sm:$0xff]  ;;  %v46_v2 = vld [vmem:[%s587_s1 + $0x10] sm:$0xff]  ;;  %35 = vst.msk [vmem:[#allocation2 + $0x8] sm:$0xff] %vm33_vm0, %v443_v3 }
   0x2   :  { %34 = vst.msk [vmem:[#allocation2] sm:$0xff] %vm33_vm0, %v443_v3  ;;  %36 = vst.msk [vmem:[#allocation3] sm:$0xff] %vm33_vm0, %v443_v3  ;;  %v418_v4 = vpack.c.bf16 %v45_v1, %v44_v0  ;;  %v47_v5 = vld [vmem:[%s587_s1 + $0x18] sm:$0xff]  ;;  %v40_v6 = vld [vmem:[%s588_s0] sm:$0xff] }
   0x3   :  { %37 = vst.msk [vmem:[#allocation3 + $0x8] sm:$0xff] %vm33_vm0, %v443_v3  ;;  %38 = vst.msk [vmem:[#allocation4] sm:$0xff] %vm33_vm0, %v443_v3  ;;  %v136_v7 = vld [vmem:[%s589_s2] sm:$0xff]  ;;  %v422_v8 = vpack.c.bf16 %v47_v5, %v46_v2  ;;  %393 = vmatprep.mubr.msk.f32.mxu0 %vm33_vm0, %v40_v6  ;;  %v137_v9 = vld [vmem:[%s589_s2 + $0x8] sm:$0xff]  ;;  %404 = vmatprep.mubr.msk.f32.mxu1 %vm33_vm0, %v40_v6 }
   0x4   :  { %39 = vst.msk [vmem:[#allocation4 + $0x8] sm:$0xff] %vm33_vm0, %v443_v3  ;;  %v221_v10 = vld [vmem:[%s590_s3] sm:$0xff]  ;;  %419 = vmatprep.subr.bf16.mxu0 %v418_v4  ;;  %v426_v11 = vpack.c.bf16 %v137_v9, %v136_v7  ;;  %v222_v12 = vld [vmem:[%s590_s3 + $0x8] sm:$0xff]  ;;  %v138_v13 = vld [vmem:[%s589_s2 + $0x10] sm:$0xff] }
   0x5   :  { %v139_v14 = vld [vmem:[%s589_s2 + $0x18] sm:$0xff]  ;;  %421 = vmatpush3.bf16.msra.mxu0 %v418_v4  ;;  %v434_v16 = vpack.c.bf16 %v222_v12, %v221_v10  ;;  %v223_v17 = vld [vmem:[%s590_s3 + $0x10] sm:$0xff]  ;;  %v41_v19 = vld [vmem:[%s588_s0 + $0x8] sm:$0xff] }
   0x6   :  { %v430_v15 = vpack.c.bf16 %v139_v14, %v138_v13  ;;  %423 = vmatprep.subr.bf16.mxu0 %v422_v8  ;;  %427 = vmatprep.subr.bf16.mxu1 %v426_v11  ;;  %v224_v18 = vld [vmem:[%s590_s3 + $0x18] sm:$0xff]  ;;  %v364_v35 = vld [vmem:[%s591_s4] ss:$0 sm:$0xff] }
   0x7   :  { %429 = vmatpush3.bf16.msra.mxu1 %v426_v11  ;;  %v438_v20 = vpack.c.bf16 %v224_v18, %v223_v17  ;;  %v365_v40 = vld [vmem:[%s592_s5] ss:$0 sm:$0xff] }
   0x8   :  { %431 = vmatprep.subr.bf16.mxu1 %v430_v15  ;;  %v43_v21 = vld [vmem:[#allocation2 + $0x8] sm:$0xff]  ;;  %v366_v49 = vld [vmem:[%s595_s6] ss:$0 sm:$0xff] }
   0x9   :  { %425 = vmatpush3.bf16.msra.mxu0 %v422_v8  ;;  %v42_v22 = vld [vmem:[#allocation2] sm:$0xff]  ;;  %v134_v27 = vld [vmem:[#allocation3] sm:$0xff] }
   0xa   :  { %435 = vmatprep.subr.bf16.mxu0 %v434_v16  ;;  %v135_v24 = vld [vmem:[#allocation3 + $0x8] sm:$0xff]  ;;  %v219_v34 = vld [vmem:[#allocation4] sm:$0xff] }
   0xb   :  { %433 = vmatpush3.bf16.msra.mxu1 %v430_v15  ;;  %v220_v33 = vld [vmem:[#allocation4 + $0x8] sm:$0xff] }
   0xc   :  { %394 = vmatmul.mubr.msk.f32.vlgmr.msra.gmra.mrb[0].mxu0 %vm33_vm0, %v41_v19 }
   0xd   :  { %437 = vmatpush3.bf16.msra.mxu0 %v434_v16  ;;  %415 = vmatprep.mubr.msk.f32.mxu0 %vm33_vm0, %v40_v6 }
   0xe   :  { %439 = vmatprep.subr.bf16.mxu0 %v438_v20  ;;  %405 = vmatmul.mubr.msk.f32.vlgmr.msra.gmra.mrb[0].mxu1 %vm33_vm0, %v41_v19 }
  0x11   :  { %441 = vmatpush3.bf16.msra.mxu0 %v438_v20 }
  0x14   :  { %416 = vmatmul.mubr.msk.f32.vlgmr.msra.gmra.mrb[2].mxu0 %vm33_vm0, %v41_v19 }
  0xdf   :  { %v395_v23 = vpop.f32.mrb[0].mxu0 }
  0xe0   :  { %v131_v25 = vadd.f32 %v395_v23, %v43_v21  ;;  %v121_v26 = vpop.f32.mrb[1].mxu0 }
  0xe1   :  { %v130_v28 = vadd.f32 %v121_v26, %v42_v22  ;;  %v406_v29 = vpop.f32.mrb[0].mxu1 }
  0xe2   :  { %133 = vst.msk [vmem:[#allocation2 + $0x8] sm:$0xff] %vm33_vm0, %v131_v25  ;;  %v216_v30 = vadd.f32 %v406_v29, %v135_v24  ;;  %v206_v31 = vpop.f32.mrb[1].mxu1 }
  0xe3   :  { %132 = vst.msk [vmem:[#allocation2] sm:$0xff] %vm33_vm0, %v130_v28  ;;  %v215_v32 = vadd.f32 %v206_v31, %v134_v27 }
  0xe4   :  { %218 = vst.msk [vmem:[#allocation3 + $0x8] sm:$0xff] %vm33_vm0, %v216_v30 }
  0xe5   :  { %217 = vst.msk [vmem:[#allocation3] sm:$0xff] %vm33_vm0, %v215_v32 }
  0xe7   :  { %v417_v36 = vpop.f32.mrb[2].mxu0 }
  0xe8   :  { %v301_v37 = vadd.f32 %v417_v36, %v220_v33  ;;  %v291_v38 = vpop.f32.mrb[3].mxu0 }
  0xe9   :  { %v308_v39 = vld [vmem:[#allocation2 + $0x8] sm:$0xff]  ;;  %v300_v41 = vadd.f32 %v291_v38, %v219_v34 }
  0xea   :  { %v317_v42 = vadd.f32 %v364_v35, %v308_v39  ;;  %v307_v43 = vld [vmem:[#allocation2] sm:$0xff]  ;;  %303 = vst.msk [vmem:[#allocation4 + $0x8] sm:$0xff] %vm33_vm0, %v301_v37 }
  0xeb   :  { %v316_v44 = vadd.f32 %v364_v35, %v307_v43  ;;  %v321_v45 = vld [vmem:[#allocation3 + $0x8] sm:$0xff]  ;;  %302 = vst.msk [vmem:[#allocation4] sm:$0xff] %vm33_vm0, %v300_v41 }
  0xec   :  { %319 = vst.msk [vmem:[%s593_s7 + $0x8] sm:$0xff] %vm33_vm0, %v317_v42  ;;  %v330_v46 = vadd.f32 %v365_v40, %v321_v45  ;;  %v320_v47 = vld [vmem:[#allocation3] sm:$0xff] }
  0xed   :  { %318 = vst.msk [vmem:[%s593_s7] sm:$0xff] %vm33_vm0, %v316_v44  ;;  %v329_v48 = vadd.f32 %v365_v40, %v320_v47 }
  0xee   :  { %332 = vst.msk [vmem:[%s594_s8 + $0x8] sm:$0xff] %vm33_vm0, %v330_v46 }
  0xef   :  { %331 = vst.msk [vmem:[%s594_s8] sm:$0xff] %vm33_vm0, %v329_v48 }
  0xf1   :  { %v334_v50 = vld [vmem:[#allocation4 + $0x8] sm:$0xff] }
  0xf2   :  { %v343_v51 = vadd.f32 %v366_v49, %v334_v50  ;;  %v333_v52 = vld [vmem:[#allocation4] sm:$0xff] }
  0xf3   :  { %v342_v53 = vadd.f32 %v366_v49, %v333_v52 }
  0xf4   :  { %345 = vst.msk [vmem:[%s596_s9 + $0x8] sm:$0xff] %vm33_vm0, %v343_v51 }
  0xf5   :  { %344 = vst.msk [vmem:[%s596_s9] sm:$0xff] %vm33_vm0, %v342_v53 }

// kernel: _lambda_.17
= control target key start
LH: loop header
LB: loop body
LE: loop exit
PB: predicated region body
PF: predicated region fallthrough
CT: control target
= control target key end

     0   :  { %s1116_s12 = smov 0   ;;  %s1226_s0 = inlined_call_operand.vmem [shape: f32[2,8,32], index: 0, kind: input, shape index: {}]   ;;  %s1227_s1 = inlined_call_operand.vmem [shape: f32[2,8,32], index: 1, kind: input, shape index: {}]   ;;  %s1228_s2 = inlined_call_operand.vmem [shape: f32[2,8,32], index: 2, kind: input, shape index: {}]   ;;  %s1229_s3 = inlined_call_operand.vmem [shape: f32[2,8,32], index: 3, kind: output, shape index: {}]  }
   0x1 LB: > { %s969_s13 = sadd.s32 4294967295, %s1086_s12   ;;  %p973_p0 = scmp.ge.s32.totalorder %s1086_s12, 1  ;;  %s1086_s12 = sphi %s1116_s12, %s13_s12  }
   0x2   : > { %p154_p1 = scmp.lt.s32.totalorder %s1086_s12, 3 }
   0x4   : > { %p155_p2 = pnand %p973_p0, %p154_p1 }
   0x5   : > { %p184_p3 = scmp.lt.s32.totalorder (!%p155_p2), %s969_s13, 1  ;;  %v1088_v0 = vmov (!%p155_p2), 0.0   ;;  %vm1089_vm0 = vmmov (!%p155_p2), 0   ;;  %vm208_vm1 = vcmask (!%p155_p2), 64512   ;;  %v203_v3 = vlaneseq (!%p155_p2)  ;;  %s1090_s21 = smov (!%p155_p2), 120  }
   0x6   : > { %158 = sbr.rel (%p155_p2) target bundleno = 1464 (0x5b8), region = 32  ;;  %1008 = vmatprep.subr.mxu0 (!%p155_p2), %v1088_v0  ;;  %1010 = vmatprep.mubr.msk.f32.mxu0 (!%p155_p2), %vm1089_vm0, %v1088_v0  ;;  %s1091_s22 = smov (!%p155_p2), 112   ;;  %vm886_vm3 = vcmask (!%p155_p2), 130048   ;;  %vm888_vm4 = vcmask (!%p155_p2), 195584   ;;  %vm890_vm5 = vcmask (!%p155_p2), 261120  }
   0x7   : > { %1013 = vmatprep.subr.mxu1 (!%p155_p2), %v1088_v0  ;;  %1015 = vmatprep.mubr.msk.f32.mxu1 (!%p155_p2), %vm1089_vm0, %v1088_v0  ;;  %v1145_v4 = vshrl.u32 (!%p155_p2), %v203_v3, 7  ;;  %v1147_v5 = vand.u32 (!%p155_p2), 127, %v203_v3  ;;  %s1092_s23 = smov (!%p155_p2), 104   ;;  %s1093_s27 = smov (!%p155_p2), 8  }
   0x8   : > { %s1094_s28 = smov (!%p155_p2), 16   ;;  %s1095_s29 = smov (!%p155_p2), 24  }
   0x9   : > { %vm207_vm2 = vcmp.le.s32.totalorder (!%p155_p2), %v1147_v5, %v1145_v4 }
   0xd   : > { %s1231_s13 = smov (!%p184_p3, %s969_s13), 1 }
   0xe   : > { %s1130_s14 = sshll.u32 %s1231_s13, 3 }
   0xf   : > { %s191_s17 = scalar_lea.vmem %s1227_s1, %s1130_s14  ;;  %s187_s20 = scalar_lea.vmem %s1226_s0, %s1130_s14 }
  0x10   : > { %v201_v1 = vld [vmem:[%s191_s17] sm:$0xff]  ;;  %s195_s26 = scalar_lea.vmem %s1228_s2, %s1130_s14  ;;  %s199_s5 = scalar_lea.vmem %s1229_s3, %s1130_s14 }
  0x11   : > { %1009 = vmatpush3.xpose.msk.msra.mxu0 %vm208_vm1, %v201_v1  ;;  %v200_v2 = vld [vmem:[%s187_s20] sm:$0xff]  ;;  %373 = vrot.lane.b32.xlu1 %v201_v1, %s1090_s21 }
  0x12   : > { %1023 = vmatprep.subr.mxu0 %v1088_v0  ;;  %v1165_v16 = vld [vmem:[%s195_s26] sm:$0xff] }
  0x13   : > { %1014 = vmatpush3.msra.mxu1 %v1165_v16 }
  0x14   : > { %1011 = vmatmul.mubr.msk.f32.vlgmr.msra.gmra.mrb[0].mxu0 %vm208_vm1, %v200_v2  ;;  %1018 = vmatprep.subr.mxu1 %v1088_v0 }
  0x15   : > { %1025 = vmatprep.mubr.msk.f32.mxu0 %vm1089_vm0, %v1088_v0  ;;  %371 = vrot.lane.b32.xlu1 %v200_v2, %s1090_s21 }
  0x19   : > { %539 = vrot.lane.b32.xlu1 %v200_v2, %s1091_s22 }
  0x1d   : > { %708 = vrot.lane.b32.xlu1 %v201_v1, %s1092_s23 }
  0x21   : > { %706 = vrot.lane.b32.xlu1 %v200_v2, %s1092_s23 }
  0x83   : > { %v374_v17 = vpop.permute.xlu1 %373 }
  0x87   : > { %v372_v19 = vpop.permute.xlu1 %371 }
  0x8b   : > { %v540_v21 = vpop.permute.xlu1 %539 }
  0x8f   : > { %v709_v24 = vpop.permute.xlu1 %708 }
  0x93   : > { %v707_v25 = vpop.permute.xlu1 %706 }
  0xe7   : > { %v281_v6 = vpop.f32.mrb[0].mxu0 }
  0xe8   : > { %v285_v7 = vmul.f32 0.35355338, %v281_v6  ;;  %v1012_v8 = vpop.f32.mrb[1].mxu0 }
  0xea   : > { %v286_v9 = vsel %vm207_vm2, %v285_v7, -1e+30 }
  0xeb   : > { %v287_v10 = vsel %vm208_vm1, %v286_v9, -inf }
  0xec   : > { %288 = vmax.xlane.f32.xlu0 %v287_v10 }
 0x179   : > { %v289_v11 = vpop.xlane.xlu0 %288 }
 0x17a   : > { %v290_v12 = vsub.f32 %v286_v9, %v289_v11 }
 0x17c   : > { %v291_v13 = vmul.f32 1.442695, %v290_v12 }
 0x17e   : > { %1064 = vpow2.f32 %v291_v13 }
 0x188   : > { %v1065_v14 = vpop.eup %1064 }
 0x189   : > { %v293_v15 = vsel %vm208_vm1, %v1065_v14, 0.0 }
 0x18a   : > { %294 = vadd.xlane.f32.xlu0 %v293_v15 }
 0x1a0   : > { %541 = vrot.lane.b32.xlu0 %v201_v1, %s1091_s22 }
 0x217   : > { %v295_v18 = vpop.xlane.xlu0 %294 }
 0x218   : > { %1066 = vrcp.f32 %v295_v18 }
 0x21b   : > { %v542_v23 = vpop.permute.xlu0 %541 }
 0x222   : > { %v1067_v20 = vpop.eup %1066 }
 0x223   : > { %v297_v22 = vmul.f32 %v1067_v20, %v1065_v14 }
 0x225   : > { %1016 = vmatmul.mubr.msk.f32.vlgmr.msra.gmra.mrb[0].mxu1 %vm208_vm1, %v297_v22 }
 0x226   : > { %1019 = vmatpush3.xpose.msk.msra.mxu1 %vm208_vm1, %v374_v17  ;;  %1020 = vmatprep.mubr.msk.f32.mxu1 %vm1089_vm0, %v1088_v0 }
 0x227   : > { %1028 = vmatprep.subr.mxu1 %v1088_v0 }
 0x229   : > { %1021 = vmatmul.mubr.msk.f32.vlgmr.msra.gmra.mrb[2].mxu1 %vm208_vm1, %v372_v19 }
 0x22a   : > { %1029 = vmatpush3.xpose.msk.msra.mxu1 %vm208_vm1, %v542_v23  ;;  %1030 = vmatprep.mubr.msk.f32.mxu1 %vm1089_vm0, %v1088_v0 }
 0x22b   : > { %1038 = vmatprep.subr.mxu1 %v1088_v0 }
 0x22d   : > { %1031 = vmatmul.mubr.msk.f32.vlgmr.msra.gmra.mrb[4].mxu1 %vm208_vm1, %v540_v21 }
 0x22e   : > { %1039 = vmatpush3.xpose.msk.msra.mxu1 %vm208_vm1, %v709_v24  ;;  %1040 = vmatprep.mubr.msk.f32.mxu1 %vm1089_vm0, %v1088_v0 }
 0x231   : > { %1041 = vmatmul.mubr.msk.f32.vlgmr.msra.gmra.mrb[6].mxu1 %vm208_vm1, %v707_v25 }
 0x2f8   : > { %v1185_v26 = vpop.f32.mrb[0].mxu1 }
 0x2f9   : > { %v1017_v27 = vpop.f32.mrb[1].mxu1 }
 0x2fc   : > { %v445_v28 = vpop.f32.mrb[2].mxu1 }
 0x2fd   : > { %v449_v29 = vmul.f32 0.35355338, %v445_v28  ;;  %v1022_v30 = vpop.f32.mrb[3].mxu1 }
 0x2ff   : > { %v450_v31 = vsel %vm207_vm2, %v449_v29, -1e+30 }
 0x300   : > { %v613_v32 = vpop.f32.mrb[4].mxu1  ;;  %v451_v33 = vsel %vm208_vm1, %v450_v31, -inf }
 0x301   : > { %v617_v34 = vmul.f32 0.35355338, %v613_v32  ;;  %452 = vmax.xlane.f32.xlu1 %v451_v33  ;;  %v1032_v35 = vpop.f32.mrb[5].mxu1 }
 0x303   : > { %v618_v36 = vsel %vm207_vm2, %v617_v34, -1e+30 }
 0x304   : > { %v780_v37 = vpop.f32.mrb[6].mxu1  ;;  %v619_v38 = vsel %vm208_vm1, %v618_v36, -inf }
 0x305   : > { %v784_v39 = vmul.f32 0.35355338, %v780_v37  ;;  %620 = vmax.xlane.f32.xlu0 %v619_v38  ;;  %v1042_v40 = vpop.f32.mrb[7].mxu1 }
 0x307   : > { %v785_v41 = vsel %vm207_vm2, %v784_v39, -1e+30 }
 0x308   : > { %v786_v42 = vsel %vm208_vm1, %v785_v41, -inf }
 0x309   : > { %787 = vmax.xlane.f32.xlu1 %v786_v42 }
 0x38e   : > { %v453_v43 = vpop.xlane.xlu1 %452 }
 0x38f   : > { %v454_v44 = vsub.f32 %v450_v31, %v453_v43 }
 0x391   : > { %v455_v45 = vmul.f32 1.442695, %v454_v44 }
 0x392   : > { %v621_v46 = vpop.xlane.xlu0 %620 }
 0x393   : > { %1068 = vpow2.f32 %v455_v45  ;;  %v622_v47 = vsub.f32 %v618_v36, %v621_v46 }
 0x395   : > { %v623_v48 = vmul.f32 1.442695, %v622_v47 }
 0x396   : > { %v788_v53 = vpop.xlane.xlu1 %787 }
 0x397   : > { %1070 = vpow2.f32 %v623_v48  ;;  %v789_v54 = vsub.f32 %v785_v41, %v788_v53 }
 0x399   : > { %v790_v55 = vmul.f32 1.442695, %v789_v54 }
 0x39b   : > { %1072 = vpow2.f32 %v790_v55 }
 0x39d   : > { %v1069_v49 = vpop.eup %1068 }
 0x39e   : > { %v457_v50 = vsel %vm208_vm1, %v1069_v49, 0.0 }
 0x39f   : > { %458 = vadd.xlane.f32.xlu1 %v457_v50 }
 0x3a1   : > { %v1071_v51 = vpop.eup %1070 }
 0x3a2   : > { %v625_v52 = vsel %vm208_vm1, %v1071_v51, 0.0 }
 0x3a3   : > { %626 = vadd.xlane.f32.xlu0 %v625_v52 }
 0x3a5   : > { %v1073_v56 = vpop.eup %1072 }
 0x3a6   : > { %v792_v57 = vsel %vm208_vm1, %v1073_v56, 0.0 }
 0x3b0   : > { %630 = vrot.lane.b32.xlu1 %v1165_v16, %s1091_s22 }
 0x3b9   : > { %463 = vrot.lane.b32.xlu0 %v1165_v16, %s1090_s21 }
 0x3d4   : > { %793 = vadd.xlane.f32.xlu1 %v792_v57 }
 0x3e5   : > { %797 = vrot.lane.b32.xlu1 %v1165_v16, %s1092_s23 }
 0x42c   : > { %v459_v58 = vpop.xlane.xlu1 %458 }
 0x42d   : > { %1074 = vrcp.f32 %v459_v58 }
 0x430   : > { %v627_v59 = vpop.xlane.xlu0 %626  ;;  %v631_v63 = vpop.permute.xlu1 %630 }
 0x431   : > { %1076 = vrcp.f32 %v627_v59 }
 0x434   : > { %v464_v60 = vpop.permute.xlu0 %463 }
 0x435   : > { %1024 = vmatpush3.msra.mxu0 %v464_v60 }
 0x436   : > { %1033 = vmatprep.subr.mxu0 %v1088_v0 }
 0x437   : > { %v1075_v61 = vpop.eup %1074 }
 0x438   : > { %v461_v62 = vmul.f32 %v1075_v61, %v1069_v49 }
 0x43a   : > { %1026 = vmatmul.mubr.msk.f32.vlgmr.msra.gmra.mrb[2].mxu0 %vm208_vm1, %v461_v62 }
 0x43b   : > { %v1077_v1 = vpop.eup %1076  ;;  %1034 = vmatpush3.msra.mxu0 %v631_v63  ;;  %1035 = vmatprep.mubr.msk.f32.mxu0 %vm1089_vm0, %v1088_v0 }
 0x43c   : > { %v629_v2 = vmul.f32 %v1077_v1, %v1071_v51  ;;  %1043 = vmatprep.subr.mxu0 %v1088_v0 }
 0x43e   : > { %1036 = vmatmul.mubr.msk.f32.vlgmr.msra.gmra.mrb[4].mxu0 %vm208_vm1, %v629_v2 }
 0x43f   : > { %1045 = vmatprep.mubr.msk.f32.mxu0 %vm1089_vm0, %v1088_v0 }
 0x461   : > { %v794_v3 = vpop.xlane.xlu1 %793 }
 0x462   : > { %1078 = vrcp.f32 %v794_v3 }
 0x465   : > { %v798_v4 = vpop.permute.xlu1 %797 }
 0x466   : > { %1044 = vmatpush3.msra.mxu0 %v798_v4 }
 0x46c   : > { %v1079_v5 = vpop.eup %1078 }
 0x46d   : > { %v796_v6 = vmul.f32 %v1079_v5, %v1073_v56 }
 0x46f   : > { %1046 = vmatmul.mubr.msk.f32.vlgmr.msra.gmra.mrb[6].mxu0 %vm208_vm1, %v796_v6 }
 0x50d   : > { %v535_v7 = vpop.f32.mrb[2].mxu0 }
 0x50e   : > { %874 = vrot.lane.b32.xlu0 %v535_v7, %s1093_s27  ;;  %v1027_v8 = vpop.f32.mrb[3].mxu0 }
 0x511   : > { %v702_v9 = vpop.f32.mrb[4].mxu0 }
 0x512   : > { %878 = vrot.lane.b32.xlu1 %v702_v9, %s1094_s28  ;;  %v1037_v10 = vpop.f32.mrb[5].mxu0 }
 0x542   : > { %v869_v11 = vpop.f32.mrb[6].mxu0 }
 0x543   : > { %882 = vrot.lane.b32.xlu0 %v869_v11, %s1095_s29  ;;  %v1047_v0 = vpop.f32.mrb[7].mxu0 }
 0x580   : > { %v875_v12 = vpop.permute.xlu0 %874 }
 0x581   : > { %v885_v14 = vsel %vm208_vm1, %v1185_v26, %v875_v12 }
 0x584   : > { %v879_v13 = vpop.permute.xlu1 %878 }
 0x585   : > { %v887_v15 = vsel %vm886_vm3, %v885_v14, %v879_v13 }
 0x5b5   : > { %v883_v16 = vpop.permute.xlu0 %882 }
 0x5b6   : > { %v889_v17 = vsel %vm888_vm4, %v887_v15, %v883_v16 }
 0x5b7   : > { %891 = vst.msk [vmem:[%s199_s5] sm:$0xff] %vm890_vm5, %v889_v17 }
 0x5b8 PF: > { %s13_s12 = sadd.s32 1, %s1086_s12  }
 0x5b9   : > { %p10_p4 = scmp.ge.s32.totalorder %s13_s12, 4  }
 0x5bb   :  { %12 = sbr.rel (!%p10_p4) target bundleno = 1 (0x1), region = 68 }

// kernel: _lambda_.20
= control target key start
LH: loop header
LB: loop body
LE: loop exit
PB: predicated region body
PF: predicated region fallthrough
CT: control target
= control target key end

     0   :  { %vm26_vm0 = vcmask 261120   ;;  %v304_v3 = vmov 0.0   ;;  %s404_s1 = inlined_call_operand.vmem [shape: f32[32,32], index: 1, kind: input, shape index: {}]   ;;  %s405_s2 = inlined_call_operand.vmem [shape: f32[32,32], index: 2, kind: input, shape index: {}]   ;;  %s406_s0 = inlined_call_operand.vmem [shape: f32[16,32], index: 0, kind: input, shape index: {}]   ;;  %s407_s3 = inlined_call_operand.vmem [shape: f32[1,32], index: 3, kind: input, shape index: {}]   ;;  %s408_s4 = inlined_call_operand.vmem [shape: f32[1,32], index: 4, kind: input, shape index: {}]   ;;  %s409_s5 = inlined_call_operand.vmem [shape: f32[16,32], index: 5, kind: output, shape index: {0}]   ;;  %s410_s6 = inlined_call_operand.vmem [shape: f32[16,32], index: 6, kind: output, shape index: {1}]  }
   0x1   :  { %v35_v0 = vld [vmem:[%s404_s1] sm:$0xff]  ;;  %v36_v1 = vld [vmem:[%s404_s1 + $0x8] sm:$0xff]  ;;  %28 = vst.msk [vmem:[#allocation2 + $0x8] sm:$0xff] %vm26_vm0, %v304_v3  ;;  %27 = vst.msk [vmem:[#allocation2] sm:$0xff] %vm26_vm0, %v304_v3 }
   0x2   :  { %v127_v2 = vld [vmem:[%s405_s2] sm:$0xff]  ;;  %29 = vst.msk [vmem:[#allocation3] sm:$0xff] %vm26_vm0, %v304_v3  ;;  %30 = vst.msk [vmem:[#allocation3 + $0x8] sm:$0xff] %vm26_vm0, %v304_v3  ;;  %v287_v4 = vpack.c.bf16 %v36_v1, %v35_v0  ;;  %v128_v5 = vld [vmem:[%s405_s2 + $0x8] sm:$0xff] }
   0x3   :  { %v37_v6 = vld [vmem:[%s404_s1 + $0x10] sm:$0xff]  ;;  %v38_v7 = vld [vmem:[%s404_s1 + $0x18] sm:$0xff]  ;;  %v295_v8 = vpack.c.bf16 %v128_v5, %v127_v2  ;;  %v31_v12 = vld [vmem:[%s406_s0] sm:$0xff] }
   0x4   :  { %v291_v9 = vpack.c.bf16 %v38_v7, %v37_v6  ;;  %v129_v10 = vld [vmem:[%s405_s2 + $0x10] sm:$0xff]  ;;  %v130_v11 = vld [vmem:[%s405_s2 + $0x18] sm:$0xff]  ;;  %288 = vmatprep.subr.bf16.mxu0 %v287_v4  ;;  %273 = vmatprep.mubr.msk.f32.mxu0 %vm26_vm0, %v31_v12  ;;  %v32_v14 = vld [vmem:[%s406_s0 + $0x8] sm:$0xff] }
   0x5   :  { %v299_v13 = vpack.c.bf16 %v130_v11, %v129_v10  ;;  %296 = vmatprep.subr.bf16.mxu1 %v295_v8  ;;  %290 = vmatpush3.bf16.msra.mxu0 %v287_v4  ;;  %v251_v27 = vld [vmem:[%s407_s3] ss:$0 sm:$0xff] }
   0x6   :  { %298 = vmatpush3.bf16.msra.mxu1 %v295_v8  ;;  %292 = vmatprep.subr.bf16.mxu0 %v291_v9  ;;  %v252_v28 = vld [vmem:[%s408_s4] ss:$0 sm:$0xff] }
   0x7   :  { %300 = vmatprep.subr.bf16.mxu1 %v299_v13  ;;  %284 = vmatprep.mubr.msk.f32.mxu1 %vm26_vm0, %v31_v12 }
   0x8   :  { %v34_v15 = vld [vmem:[#allocation2 + $0x8] sm:$0xff]  ;;  %v33_v17 = vld [vmem:[#allocation2] sm:$0xff] }
   0x9   :  { %294 = vmatpush3.bf16.msra.mxu0 %v291_v9  ;;  %v126_v16 = vld [vmem:[#allocation3 + $0x8] sm:$0xff]  ;;  %v125_v19 = vld [vmem:[#allocation3] sm:$0xff] }
   0xa   :  { %302 = vmatpush3.bf16.msra.mxu1 %v299_v13 }
   0xc   :  { %274 = vmatmul.mubr.msk.f32.vlgmr.msra.gmra.mrb[0].mxu0 %vm26_vm0, %v32_v14 }
   0xd   :  { %285 = vmatmul.mubr.msk.f32.vlgmr.msra.gmra.mrb[0].mxu1 %vm26_vm0, %v32_v14 }
  0xdf   :  { %v275_v18 = vpop.f32.mrb[0].mxu0 }
  0xe0   :  { %v122_v20 = vadd.f32 %v275_v18, %v34_v15  ;;  %v286_v21 = vpop.f32.mrb[0].mxu1  ;;  %v112_v22 = vpop.f32.mrb[1].mxu0 }
  0xe1   :  { %v207_v23 = vadd.f32 %v286_v21, %v126_v16  ;;  %v121_v24 = vadd.f32 %v112_v22, %v33_v17  ;;  %v197_v25 = vpop.f32.mrb[1].mxu1 }
  0xe2   :  { %124 = vst.msk [vmem:[#allocation2 + $0x8] sm:$0xff] %vm26_vm0, %v122_v20  ;;  %v206_v26 = vadd.f32 %v197_v25, %v125_v19 }
  0xe3   :  { %209 = vst.msk [vmem:[#allocation3 + $0x8] sm:$0xff] %vm26_vm0, %v207_v23  ;;  %123 = vst.msk [vmem:[#allocation2] sm:$0xff] %vm26_vm0, %v121_v24 }
  0xe4   :  { %208 = vst.msk [vmem:[#allocation3] sm:$0xff] %vm26_vm0, %v206_v26 }
  0xe9   :  { %v214_v29 = vld [vmem:[#allocation2 + $0x8] sm:$0xff] }
  0xea   :  { %v223_v30 = vadd.f32 %v251_v27, %v214_v29  ;;  %v227_v31 = vld [vmem:[#allocation3 + $0x8] sm:$0xff]  ;;  %v213_v32 = vld [vmem:[#allocation2] sm:$0xff] }
  0xeb   :  { %v236_v33 = vadd.f32 %v252_v28, %v227_v31  ;;  %v222_v34 = vadd.f32 %v251_v27, %v213_v32  ;;  %v226_v35 = vld [vmem:[#allocation3] sm:$0xff] }
  0xec   :  { %225 = vst.msk [vmem:[%s409_s5 + $0x8] sm:$0xff] %vm26_vm0, %v223_v30  ;;  %v235_v36 = vadd.f32 %v252_v28, %v226_v35 }
  0xed   :  { %238 = vst.msk [vmem:[%s410_s6 + $0x8] sm:$0xff] %vm26_vm0, %v236_v33  ;;  %224 = vst.msk [vmem:[%s409_s5] sm:$0xff] %vm26_vm0, %v222_v34 }
  0xee   :  { %237 = vst.msk [vmem:[%s410_s6] sm:$0xff] %vm26_vm0, %v235_v36 }

// kernel: _lambda_.23
= control target key start
LH: loop header
LB: loop body
LE: loop exit
PB: predicated region body
PF: predicated region fallthrough
CT: control target
= control target key end

     0   :  { %vm30_vm0 = vcmask 261120   ;;  %v378_v20 = vmov 0.0   ;;  %vm140_vm1 = vcmask 523264   ;;  %s491_s1 = inlined_call_operand.vmem [shape: f32[32,64], index: 1, kind: input, shape index: {}]   ;;  %s492_s0 = inlined_call_operand.vmem [shape: f32[16,32], index: 0, kind: input, shape index: {}]   ;;  %s493_s3 = inlined_call_operand.vmem [shape: f32[64,32], index: 3, kind: input, shape index: {}]   ;;  %s494_s2 = inlined_call_operand.vmem [shape: f32[1,64], index: 2, kind: input, shape index: {}]   ;;  %s495_s4 = inlined_call_operand.vmem [shape: f32[1,32], index: 4, kind: input, shape index: {}]   ;;  %s496_s5 = inlined_call_operand.vmem [shape: f32[1,32], index: 5, kind: input, shape index: {}]   ;;  %s497_s6 = inlined_call_operand.vmem [shape: f32[1,32], index: 6, kind: input, shape index: {}]   ;;  %s498_s7 = inlined_call_operand.vmem [shape: f32[16,32], index: 7, kind: output, shape index: {}]  }
   0x1   :  { %v35_v0 = vld [vmem:[%s491_s1] sm:$0xff]  ;;  %v36_v1 = vld [vmem:[%s491_s1 + $0x8] sm:$0xff]  ;;  %v37_v2 = vld [vmem:[%s491_s1 + $0x10] sm:$0xff]  ;;  %32 = vst.msk [vmem:[#allocation2 + $0x8] sm:$0xff] %vm30_vm0, %v378_v20 }
   0x2   :  { %v349_v3 = vpack.c.bf16 %v36_v1, %v35_v0  ;;  %v38_v4 = vld [vmem:[%s491_s1 + $0x18] sm:$0xff]  ;;  %v33_v5 = vld [vmem:[%s492_s0] sm:$0xff]  ;;  %v133_v8 = vld [vmem:[%s493_s3 + $0x8] sm:$0xff]  ;;  %31 = vst.msk [vmem:[#allocation2] sm:$0xff] %vm30_vm0, %v378_v20 }
   0x3   :  { %v353_v6 = vpack.c.bf16 %v38_v4, %v37_v2  ;;  %327 = vmatprep.mubr.msk.f32.mxu0 %vm30_vm0, %v33_v5  ;;  %v132_v7 = vld [vmem:[%s493_s3] sm:$0xff]  ;;  %v134_v9 = vld [vmem:[%s493_s3 + $0x10] sm:$0xff]  ;;  %v135_v11 = vld [vmem:[%s493_s3 + $0x18] sm:$0xff] }
   0x4   :  { %350 = vmatprep.subr.bf16.mxu0 %v349_v3  ;;  %v357_v10 = vpack.c.bf16 %v133_v8, %v132_v7  ;;  %v361_v12 = vpack.c.bf16 %v135_v11, %v134_v9  ;;  %v136_v13 = vld [vmem:[%s493_s3 + $0x20] sm:$0xff]  ;;  %v137_v14 = vld [vmem:[%s493_s3 + $0x28] sm:$0xff]  ;;  %v138_v17 = vld [vmem:[%s493_s3 + $0x30] sm:$0xff] }
   0x5   :  { %352 = vmatpush3.bf16.msra.mxu0 %v349_v3  ;;  %v365_v15 = vpack.c.bf16 %v137_v14, %v136_v13  ;;  %v34_v16 = vld [vmem:[%s492_s0 + $0x8] sm:$0xff]  ;;  %v139_v18 = vld [vmem:[%s493_s3 + $0x38] sm:$0xff]  ;;  %v295_v21 = vld [vmem:[%s494_s2] ss:$0 sm:$0xff] }
   0x6   :  { %354 = vmatprep.subr.bf16.mxu0 %v353_v6  ;;  %358 = vmatprep.subr.bf16.mxu1 %v357_v10  ;;  %v369_v19 = vpack.c.bf16 %v139_v18, %v138_v17  ;;  %v300_v34 = vld [vmem:[%s495_s4] ss:$0 sm:$0xff] }
   0x7   :  { %360 = vmatpush3.bf16.msra.mxu1 %v357_v10  ;;  %v301_v60 = vld [vmem:[%s496_s5] ss:$0 sm:$0xff] }
   0x8   :  { %362 = vmatprep.subr.bf16.mxu1 %v361_v12  ;;  %v131_v28 = vld [vmem:[#allocation2 + $0x8] sm:$0xff]  ;;  %v302_v62 = vld [vmem:[%s497_s6] ss:$0 sm:$0xff] }
   0x9   :  { %356 = vmatpush3.bf16.msra.mxu0 %v353_v6  ;;  %v130_v29 = vld [vmem:[#allocation2] sm:$0xff] }
   0xb   :  { %364 = vmatpush3.bf16.msra.mxu1 %v361_v12 }
   0xc   :  { %328 = vmatmul.mubr.msk.f32.vlgmr.msra.gmra.mrb[0].mxu0 %vm30_vm0, %v34_v16  ;;  %366 = vmatprep.subr.bf16.mxu1 %v365_v15 }
   0xf   :  { %368 = vmatpush3.bf16.msra.mxu1 %v365_v15 }
  0x10   :  { %370 = vmatprep.subr.bf16.mxu1 %v369_v19 }
  0x13   :  { %372 = vmatpush3.bf16.msra.mxu1 %v369_v19 }
  0xdf   :  { %v329_v22 = vpop.f32.mrb[0].mxu0 }
  0xe0   :  { %v125_v23 = vadd.f32 %v329_v22, %v295_v21  ;;  %v119_v24 = vpop.f32.mrb[1].mxu0 }
  0xe1   :  { %v120_v25 = vadd.f32 %v295_v21, %v119_v24 }
  0xe2   :  { %v129_v27 = vmax.f32 %v125_v23, 0.0 }
  0xe3   :  { %v128_v26 = vmax.f32 %v120_v25, 0.0 }
  0xe5   :  { %346 = vmatprep.mubr.msk.f32.mxu1 %vm140_vm1, %v128_v26 }
  0xe6   :  { %347 = vmatmul.mubr.msk.f32.vlgmr.msra.gmra.mrb[0].mxu1 %vm140_vm1, %v129_v27 }
 0x1b9   :  { %v348_v30 = vpop.f32.mrb[0].mxu1 }
 0x1ba   :  { %v223_v31 = vadd.f32 %v348_v30, %v131_v28  ;;  %v213_v32 = vpop.f32.mrb[1].mxu1 }
 0x1bb   :  { %v222_v33 = vadd.f32 %v213_v32, %v130_v29 }
 0x1bc   :  { %225 = vst.msk [vmem:[#allocation2 + $0x8] sm:$0xff] %vm30_vm0, %v223_v31 }
 0x1bd   :  { %224 = vst.msk [vmem:[#allocation2] sm:$0xff] %vm30_vm0, %v222_v33 }
 0x1c3   :  { %v230_v35 = vld [vmem:[#allocation2 + $0x8] sm:$0xff] }
 0x1c4   :  { %v229_v36 = vld [vmem:[#allocation2] sm:$0xff]  ;;  %v239_v38 = vadd.f32 %v300_v34, %v230_v35 }
 0x1c5   :  { %v238_v37 = vadd.f32 %v300_v34, %v229_v36 }
 0x1c6   :  { %v243_v41 = vadd.f32 %v239_v38, %v34_v16 }
 0x1c7   :  { %v242_v39 = vadd.f32 %v238_v37, %v33_v5 }
 0x1c8   :  { %v247_v42 = vsel %vm30_vm0, %v243_v41, 0.0 }
 0x1c9   :  { %v244_v40 = vsel %vm30_vm0, %v242_v39, 0.0 }
 0x1ca   :  { %245 = vadd.xlane.f32.xlu0 %v244_v40 }
 0x1ce   :  { %248 = vadd.xlane.f32.xlu0 %v247_v42 }
 0x257   :  { %v246_v43 = vpop.xlane.xlu0 %245 }
 0x258   :  { %v251_v44 = vmul.f32 0.03125, %v246_v43 }
 0x25a   :  { %v253_v45 = vsub.f32 %v242_v39, %v251_v44 }
 0x25b   :  { %v249_v46 = vpop.xlane.xlu0 %248 }
 0x25c   :  { %v252_v47 = vmul.f32 0.03125, %v249_v46  ;;  %v255_v48 = vmul.f32 %v253_v45, %v253_v45 }
 0x25e   :  { %v254_v49 = vsub.f32 %v243_v41, %v252_v47  ;;  %v257_v50 = vsel %vm30_vm0, %v255_v48, 0.0 }
 0x25f   :  { %258 = vadd.xlane.f32.xlu1 %v257_v50 }
 0x260   :  { %v256_v51 = vmul.f32 %v254_v49, %v254_v49 }
 0x262   :  { %v260_v52 = vsel %vm30_vm0, %v256_v51, 0.0 }
 0x263   :  { %261 = vadd.xlane.f32.xlu1 %v260_v52 }
 0x2ec   :  { %v259_v53 = vpop.xlane.xlu1 %258 }
 0x2ed   :  { %v263_v54 = vmul.f32 0.03125, %v259_v53 }
 0x2ef   :  { %v265_v55 = vadd.f32 1e-05, %v263_v54 }
 0x2f0   :  { %v262_v56 = vpop.xlane.xlu1 %261 }
 0x2f1   :  { %374 = vrsqrt.f32 %v265_v55  ;;  %v264_v57 = vmul.f32 0.03125, %v262_v56 }
 0x2f3   :  { %v266_v58 = vadd.f32 1e-05, %v264_v57 }
 0x2f5   :  { %376 = vrsqrt.f32 %v266_v58 }
 0x2fb   :  { %v375_v59 = vpop.eup %374 }
 0x2fc   :  { %v269_v61 = vmul.f32 %v375_v59, %v253_v45 }
 0x2fe   :  { %v278_v63 = vmul.f32 %v301_v60, %v269_v61 }
 0x2ff   :  { %v377_v0 = vpop.eup %376 }
 0x300   :  { %v287_v1 = vadd.f32 %v302_v62, %v278_v63  ;;  %v270_v2 = vmul.f32 %v377_v0, %v254_v49 }
 0x302   :  { %289 = vst.msk [vmem:[%s498_s7] sm:$0xff] %vm30_vm0, %v287_v1  ;;  %v279_v3 = vmul.f32 %v301_v60, %v270_v2 }
 0x304   :  { %v288_v4 = vadd.f32 %v302_v62, %v279_v3 }
 0x306   :  { %290 = vst.msk [vmem:[%s498_s7 + $0x8] sm:$0xff] %vm30_vm0, %v288_v4 }

// kernel: _lambda_.21
= control target key start
LH: loop header
LB: loop body
LE: loop exit
PB: predicated region body
PF: predicated region fallthrough
CT: control target
= control target key end

     0   :  { %s1107_s12 = smov 0   ;;  %s1199_s0 = inlined_call_operand.vmem [shape: f32[2,8,32], index: 0, kind: input, shape index: {}]   ;;  %s1200_s1 = inlined_call_operand.vmem [shape: f32[2,8,32], index: 1, kind: input, shape index: {}]   ;;  %s1201_s2 = inlined_call_operand.vmem [shape: f32[2,8,32], index: 2, kind: input, shape index: {}]   ;;  %s1202_s3 = inlined_call_operand.vmem [shape: f32[2,8,32], index: 3, kind: output, shape index: {}]  }
   0x1 LB: > { %s960_s13 = sadd.s32 4294967295, %s1077_s12   ;;  %p964_p0 = scmp.ge.s32.totalorder %s1077_s12, 1  ;;  %s1077_s12 = sphi %s1107_s12, %s13_s12  }
   0x2   : > { %p154_p1 = scmp.lt.s32.totalorder %s1077_s12, 3 }
   0x4   : > { %p155_p2 = pnand %p964_p0, %p154_p1 }
   0x5   : > { %p184_p3 = scmp.lt.s32.totalorder (!%p155_p2), %s960_s13, 1  ;;  %v1079_v0 = vmov (!%p155_p2), 0.0   ;;  %vm1080_vm0 = vmmov (!%p155_p2), 0   ;;  %vm203_vm1 = vcmask (!%p155_p2), 64512   ;;  %s1081_s21 = smov (!%p155_p2), 120   ;;  %vm877_vm2 = vcmask (!%p155_p2), 130048  }
   0x6   : > { %158 = sbr.rel (%p155_p2) target bundleno = 1462 (0x5b6), region = 32  ;;  %999 = vmatprep.subr.mxu0 (!%p155_p2), %v1079_v0  ;;  %1001 = vmatprep.mubr.msk.f32.mxu0 (!%p155_p2), %vm1080_vm0, %v1079_v0  ;;  %s1082_s22 = smov (!%p155_p2), 112   ;;  %vm879_vm3 = vcmask (!%p155_p2), 195584   ;;  %vm881_vm4 = vcmask (!%p155_p2), 261120  }
   0x7   : > { %1004 = vmatprep.subr.mxu1 (!%p155_p2), %v1079_v0  ;;  %1006 = vmatprep.mubr.msk.f32.mxu1 (!%p155_p2), %vm1080_vm0, %v1079_v0  ;;  %s1083_s23 = smov (!%p155_p2), 104   ;;  %s1084_s27 = smov (!%p155_p2), 8  }
   0x8   : > { %s1085_s28 = smov (!%p155_p2), 16   ;;  %s1086_s29 = smov (!%p155_p2), 24  }
   0xd   : > { %s1204_s13 = smov (!%p184_p3, %s960_s13), 1 }
   0xe   : > { %s1121_s14 = sshll.u32 %s1204_s13, 3 }
   0xf   : > { %s191_s17 = scalar_lea.vmem %s1200_s1, %s1121_s14  ;;  %s187_s20 = scalar_lea.vmem %s1199_s0, %s1121_s14 }
  0x10   : > { %v201_v1 = vld [vmem:[%s191_s17] sm:$0xff]  ;;  %s195_s26 = scalar_lea.vmem %s1201_s2, %s1121_s14  ;;  %s199_s5 = scalar_lea.vmem %s1202_s3, %s1121_s14 }
  0x11   : > { %1000 = vmatpush3.xpose.msk.msra.mxu0 %vm203_vm1, %v201_v1  ;;  %v200_v2 = vld [vmem:[%s187_s20] sm:$0xff]  ;;  %367 = vrot.lane.b32.xlu1 %v201_v1, %s1081_s21 }
  0x12   : > { %1014 = vmatprep.subr.mxu0 %v1079_v0  ;;  %v1147_v12 = vld [vmem:[%s195_s26] sm:$0xff] }
  0x13   : > { %1005 = vmatpush3.msra.mxu1 %v1147_v12 }
  0x14   : > { %1002 = vmatmul.mubr.msk.f32.vlgmr.msra.gmra.mrb[0].mxu0 %vm203_vm1, %v200_v2  ;;  %1009 = vmatprep.subr.mxu1 %v1079_v0 }
  0x15   : > { %1016 = vmatprep.mubr.msk.f32.mxu0 %vm1080_vm0, %v1079_v0  ;;  %365 = vrot.lane.b32.xlu1 %v200_v2, %s1081_s21 }
  0x19   : > { %532 = vrot.lane.b32.xlu1 %v200_v2, %s1082_s22 }
  0x1d   : > { %700 = vrot.lane.b32.xlu1 %v201_v1, %s1083_s23 }
  0x21   : > { %698 = vrot.lane.b32.xlu1 %v200_v2, %s1083_s23 }
  0x83   : > { %v368_v13 = vpop.permute.xlu1 %367 }
  0x87   : > { %v366_v15 = vpop.permute.xlu1 %365 }
  0x8b   : > { %v533_v17 = vpop.permute.xlu1 %532 }
  0x8f   : > { %v701_v20 = vpop.permute.xlu1 %700 }
  0x93   : > { %v699_v21 = vpop.permute.xlu1 %698 }
  0xe7   : > { %v276_v3 = vpop.f32.mrb[0].mxu0 }
  0xe8   : > { %v280_v4 = vmul.f32 0.35355338, %v276_v3  ;;  %v1003_v5 = vpop.f32.mrb[1].mxu0 }
  0xea   : > { %v281_v6 = vsel %vm203_vm1, %v280_v4, -inf }
  0xeb   : > { %282 = vmax.xlane.f32.xlu0 %v281_v6 }
 0x178   : > { %v283_v7 = vpop.xlane.xlu0 %282 }
 0x179   : > { %v284_v8 = vsub.f32 %v280_v4, %v283_v7 }
 0x17b   : > { %v285_v9 = vmul.f32 1.442695, %v284_v8 }
 0x17d   : > { %1055 = vpow2.f32 %v285_v9 }
 0x187   : > { %v1056_v10 = vpop.eup %1055 }
 0x188   : > { %v287_v11 = vsel %vm203_vm1, %v1056_v10, 0.0 }
 0x189   : > { %288 = vadd.xlane.f32.xlu0 %v287_v11 }
 0x19f   : > { %534 = vrot.lane.b32.xlu0 %v201_v1, %s1082_s22 }
 0x216   : > { %v289_v14 = vpop.xlane.xlu0 %288 }
 0x217   : > { %1057 = vrcp.f32 %v289_v14 }
 0x21a   : > { %v535_v19 = vpop.permute.xlu0 %534 }
 0x221   : > { %v1058_v16 = vpop.eup %1057 }
 0x222   : > { %v291_v18 = vmul.f32 %v1058_v16, %v1056_v10 }
 0x224   : > { %1007 = vmatmul.mubr.msk.f32.vlgmr.msra.gmra.mrb[0].mxu1 %vm203_vm1, %v291_v18 }
 0x225   : > { %1010 = vmatpush3.xpose.msk.msra.mxu1 %vm203_vm1, %v368_v13  ;;  %1011 = vmatprep.mubr.msk.f32.mxu1 %vm1080_vm0, %v1079_v0 }
 0x226   : > { %1019 = vmatprep.subr.mxu1 %v1079_v0 }
 0x228   : > { %1012 = vmatmul.mubr.msk.f32.vlgmr.msra.gmra.mrb[2].mxu1 %vm203_vm1, %v366_v15 }
 0x229   : > { %1020 = vmatpush3.xpose.msk.msra.mxu1 %vm203_vm1, %v535_v19  ;;  %1021 = vmatprep.mubr.msk.f32.mxu1 %vm1080_vm0, %v1079_v0 }
 0x22a   : > { %1029 = vmatprep.subr.mxu1 %v1079_v0 }
 0x22c   : > { %1022 = vmatmul.mubr.msk.f32.vlgmr.msra.gmra.mrb[4].mxu1 %vm203_vm1, %v533_v17 }
 0x22d   : > { %1030 = vmatpush3.xpose.msk.msra.mxu1 %vm203_vm1, %v701_v20  ;;  %1031 = vmatprep.mubr.msk.f32.mxu1 %vm1080_vm0, %v1079_v0 }
 0x230   : > { %1032 = vmatmul.mubr.msk.f32.vlgmr.msra.gmra.mrb[6].mxu1 %vm203_vm1, %v699_v21 }
 0x2f7   : > { %v1167_v22 = vpop.f32.mrb[0].mxu1 }
 0x2f8   : > { %v1008_v23 = vpop.f32.mrb[1].mxu1 }
 0x2fb   : > { %v439_v24 = vpop.f32.mrb[2].mxu1 }
 0x2fc   : > { %v443_v25 = vmul.f32 0.35355338, %v439_v24  ;;  %v1013_v26 = vpop.f32.mrb[3].mxu1 }
 0x2fe   : > { %v444_v27 = vsel %vm203_vm1, %v443_v25, -inf }
 0x2ff   : > { %445 = vmax.xlane.f32.xlu1 %v444_v27  ;;  %v606_v28 = vpop.f32.mrb[4].mxu1 }
 0x300   : > { %v610_v29 = vmul.f32 0.35355338, %v606_v28  ;;  %v1023_v30 = vpop.f32.mrb[5].mxu1 }
 0x302   : > { %v611_v31 = vsel %vm203_vm1, %v610_v29, -inf }
 0x303   : > { %612 = vmax.xlane.f32.xlu0 %v611_v31  ;;  %v772_v32 = vpop.f32.mrb[6].mxu1 }
 0x304   : > { %v776_v33 = vmul.f32 0.35355338, %v772_v32  ;;  %v1033_v34 = vpop.f32.mrb[7].mxu1 }
 0x306   : > { %v777_v35 = vsel %vm203_vm1, %v776_v33, -inf }
 0x307   : > { %778 = vmax.xlane.f32.xlu1 %v777_v35 }
 0x38c   : > { %v446_v36 = vpop.xlane.xlu1 %445 }
 0x38d   : > { %v447_v37 = vsub.f32 %v443_v25, %v446_v36 }
 0x38f   : > { %v448_v38 = vmul.f32 1.442695, %v447_v37 }
 0x390   : > { %v613_v39 = vpop.xlane.xlu0 %612 }
 0x391   : > { %1059 = vpow2.f32 %v448_v38  ;;  %v614_v40 = vsub.f32 %v610_v29, %v613_v39 }
 0x393   : > { %v615_v41 = vmul.f32 1.442695, %v614_v40 }
 0x394   : > { %v779_v46 = vpop.xlane.xlu1 %778 }
 0x395   : > { %1061 = vpow2.f32 %v615_v41  ;;  %v780_v47 = vsub.f32 %v776_v33, %v779_v46 }
 0x397   : > { %v781_v48 = vmul.f32 1.442695, %v780_v47 }
 0x399   : > { %1063 = vpow2.f32 %v781_v48 }
 0x39b   : > { %v1060_v42 = vpop.eup %1059 }
 0x39c   : > { %v450_v43 = vsel %vm203_vm1, %v1060_v42, 0.0 }
 0x39d   : > { %451 = vadd.xlane.f32.xlu1 %v450_v43 }
 0x39f   : > { %v1062_v44 = vpop.eup %1061 }
 0x3a0   : > { %v617_v45 = vsel %vm203_vm1, %v1062_v44, 0.0 }
 0x3a1   : > { %618 = vadd.xlane.f32.xlu0 %v617_v45 }
 0x3a3   : > { %v1064_v49 = vpop.eup %1063 }
 0x3a4   : > { %v783_v50 = vsel %vm203_vm1, %v1064_v49, 0.0 }
 0x3ae   : > { %622 = vrot.lane.b32.xlu1 %v1147_v12, %s1082_s22 }
 0x3b7   : > { %456 = vrot.lane.b32.xlu0 %v1147_v12, %s1081_s21 }
 0x3d2   : > { %784 = vadd.xlane.f32.xlu1 %v783_v50 }
 0x3e3   : > { %788 = vrot.lane.b32.xlu1 %v1147_v12, %s1083_s23 }
 0x42a   : > { %v452_v51 = vpop.xlane.xlu1 %451 }
 0x42b   : > { %1065 = vrcp.f32 %v452_v51 }
 0x42e   : > { %v619_v52 = vpop.xlane.xlu0 %618  ;;  %v623_v56 = vpop.permute.xlu1 %622 }
 0x42f   : > { %1067 = vrcp.f32 %v619_v52 }
 0x432   : > { %v457_v53 = vpop.permute.xlu0 %456 }
 0x433   : > { %1015 = vmatpush3.msra.mxu0 %v457_v53 }
 0x434   : > { %1024 = vmatprep.subr.mxu0 %v1079_v0 }
 0x435   : > { %v1066_v54 = vpop.eup %1065 }
 0x436   : > { %v454_v55 = vmul.f32 %v1066_v54, %v1060_v42 }
 0x438   : > { %1017 = vmatmul.mubr.msk.f32.vlgmr.msra.gmra.mrb[2].mxu0 %vm203_vm1, %v454_v55 }
 0x439   : > { %v1068_v57 = vpop.eup %1067  ;;  %1025 = vmatpush3.msra.mxu0 %v623_v56  ;;  %1026 = vmatprep.mubr.msk.f32.mxu0 %vm1080_vm0, %v1079_v0 }
 0x43a   : > { %v621_v58 = vmul.f32 %v1068_v57, %v1062_v44  ;;  %1034 = vmatprep.subr.mxu0 %v1079_v0 }
 0x43c   : > { %1027 = vmatmul.mubr.msk.f32.vlgmr.msra.gmra.mrb[4].mxu0 %vm203_vm1, %v621_v58 }
 0x43d   : > { %1036 = vmatprep.mubr.msk.f32.mxu0 %vm1080_vm0, %v1079_v0 }
 0x45f   : > { %v785_v59 = vpop.xlane.xlu1 %784 }
 0x460   : > { %1069 = vrcp.f32 %v785_v59 }
 0x463   : > { %v789_v60 = vpop.permute.xlu1 %788 }
 0x464   : > { %1035 = vmatpush3.msra.mxu0 %v789_v60 }
 0x46a   : > { %v1070_v61 = vpop.eup %1069 }
 0x46b   : > { %v787_v62 = vmul.f32 %v1070_v61, %v1064_v49 }
 0x46d   : > { %1037 = vmatmul.mubr.msk.f32.vlgmr.msra.gmra.mrb[6].mxu0 %vm203_vm1, %v787_v62 }
 0x50b   : > { %v528_v63 = vpop.f32.mrb[2].mxu0 }
 0x50c   : > { %865 = vrot.lane.b32.xlu0 %v528_v63, %s1084_s27  ;;  %v1018_v1 = vpop.f32.mrb[3].mxu0 }
 0x50f   : > { %v694_v2 = vpop.f32.mrb[4].mxu0 }
 0x510   : > { %869 = vrot.lane.b32.xlu1 %v694_v2, %s1085_s28  ;;  %v1028_v3 = vpop.f32.mrb[5].mxu0 }
 0x540   : > { %v860_v4 = vpop.f32.mrb[6].mxu0 }
 0x541   : > { %873 = vrot.lane.b32.xlu0 %v860_v4, %s1086_s29  ;;  %v1038_v0 = vpop.f32.mrb[7].mxu0 }
 0x57e   : > { %v866_v5 = vpop.permute.xlu0 %865 }
 0x57f   : > { %v876_v7 = vsel %vm203_vm1, %v1167_v22, %v866_v5 }
 0x582   : > { %v870_v6 = vpop.permute.xlu1 %869 }
 0x583   : > { %v878_v8 = vsel %vm877_vm2, %v876_v7, %v870_v6 }
 0x5b3   : > { %v874_v9 = vpop.permute.xlu0 %873 }
 0x5b4   : > { %v880_v10 = vsel %vm879_vm3, %v878_v8, %v874_v9 }
 0x5b5   : > { %882 = vst.msk [vmem:[%s199_s5] sm:$0xff] %vm881_vm4, %v880_v10 }
 0x5b6 PF: > { %s13_s12 = sadd.s32 1, %s1077_s12  }
 0x5b7   : > { %p10_p4 = scmp.ge.s32.totalorder %s13_s12, 4  }
 0x5b9   :  { %12 = sbr.rel (!%p10_p4) target bundleno = 1 (0x1), region = 68 }

// kernel: _lambda_.31
= control target key start
LH: loop header
LB: loop body
LE: loop exit
PB: predicated region body
PF: predicated region fallthrough
CT: control target
= control target key end

     0   :  { %vm31_vm0 = vcmask 261120   ;;  %s540_s0 = inlined_call_operand.vmem [shape: f32[16,32], index: 0, kind: input, shape index: {}]   ;;  %s541_s1 = inlined_call_operand.vmem [shape: f32[32,64], index: 1, kind: input, shape index: {}]   ;;  %s542_s2 = inlined_call_operand.vmem [shape: f32[1,64], index: 2, kind: input, shape index: {}]   ;;  %s543_s3 = inlined_call_operand.vmem [shape: f32[64,32], index: 3, kind: input, shape index: {}]   ;;  %s544_s4 = inlined_call_operand.vmem [shape: f32[1,32], index: 4, kind: input, shape index: {}]   ;;  %s545_s5 = inlined_call_operand.vmem [shape: f32[1,32], index: 5, kind: input, shape index: {}]   ;;  %s546_s6 = inlined_call_operand.vmem [shape: f32[1,32], index: 6, kind: input, shape index: {}]   ;;  %s547_s7 = inlined_call_operand.hbm [shape: f32[16,32], index: 7, kind: output, shape index: {}]  }
   0x1   :  { %v36_v0 = vld [vmem:[%s541_s1] sm:$0xff]  ;;  %v37_v1 = vld [vmem:[%s541_s1 + $0x8] sm:$0xff]  ;;  %v38_v2 = vld [vmem:[%s541_s1 + $0x10] sm:$0xff] }
   0x2   :  { %v362_v3 = vpack.c.bf16 %v37_v1, %v36_v0  ;;  %v39_v4 = vld [vmem:[%s541_s1 + $0x18] sm:$0xff]  ;;  %v34_v5 = vld [vmem:[%s540_s0] sm:$0xff]  ;;  %v134_v8 = vld [vmem:[%s543_s3 + $0x8] sm:$0xff] }
   0x3   :  { %v366_v6 = vpack.c.bf16 %v39_v4, %v38_v2  ;;  %340 = vmatprep.mubr.msk.f32.mxu0 %vm31_vm0, %v34_v5  ;;  %v133_v7 = vld [vmem:[%s543_s3] sm:$0xff]  ;;  %v135_v9 = vld [vmem:[%s543_s3 + $0x10] sm:$0xff]  ;;  %v136_v11 = vld [vmem:[%s543_s3 + $0x18] sm:$0xff] }
   0x4   :  { %363 = vmatprep.subr.bf16.mxu0 %v362_v3  ;;  %v370_v10 = vpack.c.bf16 %v134_v8, %v133_v7  ;;  %v374_v12 = vpack.c.bf16 %v136_v11, %v135_v9  ;;  %v137_v13 = vld [vmem:[%s543_s3 + $0x20] sm:$0xff]  ;;  %v138_v14 = vld [vmem:[%s543_s3 + $0x28] sm:$0xff] }
   0x5   :  { %365 = vmatpush3.bf16.msra.mxu0 %v362_v3 }
   0x6   :  { %12 = vsyncpa [#allocation4], 0  ;;  %367 = vmatprep.subr.bf16.mxu0 %v366_v6  ;;  %371 = vmatprep.subr.bf16.mxu1 %v370_v10  ;;  %v378_v15 = vpack.c.bf16 %v138_v14, %v137_v13  ;;  %v35_v16 = vld [vmem:[%s540_s0 + $0x8] sm:$0xff]  ;;  %v139_v17 = vld [vmem:[%s543_s3 + $0x30] sm:$0xff]  ;;  %v418_v20 = vmov 0.0   ;;  %vm141_vm1 = vcmask 523264  }
   0x7   :  { %373 = vmatpush3.bf16.msra.mxu1 %v370_v10  ;;  %v140_v18 = vld [vmem:[%s543_s3 + $0x38] sm:$0xff]  ;;  %33 = vst.msk [vmem:[#allocation2 + $0x8] sm:$0xff] %vm31_vm0, %v418_v20  ;;  %32 = vst.msk [vmem:[#allocation2] sm:$0xff] %vm31_vm0, %v418_v20  ;;  %v308_v21 = vld [vmem:[%s542_s2] ss:$0 sm:$0xff]  ;;  %s419_s9 = smov [#allocation3]  }
   0x8   :  { %375 = vmatprep.subr.bf16.mxu1 %v374_v12  ;;  %v382_v19 = vpack.c.bf16 %v140_v18, %v139_v17  ;;  %v313_v34 = vld [vmem:[%s544_s4] ss:$0 sm:$0xff]  ;;  %s297_s10 = sshll.u32 %s419_s9, 4  ;;  %s298_s10 = int_to_ptr.vmem [resolvable:$true] %s297_s10 }
   0x9   :  { %369 = vmatpush3.bf16.msra.mxu0 %v366_v6  ;;  %v314_v60 = vld [vmem:[%s545_s5] ss:$0 sm:$0xff]  ;;  %s394_s11 = scalar_lea.vmem %s298_s10, 256  ;;  %p399_p1 = scmp.lt.s32.totalorder %s298_s10, %s298_s10 }
   0xa   :  { %v315_v62 = vld [vmem:[%s546_s6] ss:$0 sm:$0xff]  ;;  %p395_p0 = scmp.ne.s32.totalorder %s298_s10, %s394_s11  ;;  %p400_p2 = scmp.lt.s32.totalorder %s394_s11, %s394_s11 }
   0xb   :  { %377 = vmatpush3.bf16.msra.mxu1 %v374_v12 }
   0xc   :  { %341 = vmatmul.mubr.msk.f32.vlgmr.msra.gmra.mrb[0].mxu0 %vm31_vm0, %v35_v16  ;;  %379 = vmatprep.subr.bf16.mxu1 %v378_v15  ;;  %p401_p3 = por %p400_p2, %p399_p1 }
   0xe   :  { %v132_v28 = vld [vmem:[#allocation2 + $0x8] sm:$0xff]  ;;  %v131_v29 = vld [vmem:[#allocation2] sm:$0xff]  ;;  %p402_p4 = pnand %p401_p3, %p395_p0 }
   0xf   :  { %381 = vmatpush3.bf16.msra.mxu1 %v378_v15 }
  0x10   :  { %383 = vmatprep.subr.bf16.mxu1 %v382_v19 }
  0x13   :  { %385 = vmatpush3.bf16.msra.mxu1 %v382_v19 }
  0xdf   :  { %v342_v22 = vpop.f32.mrb[0].mxu0 }
  0xe0   :  { %v126_v23 = vadd.f32 %v342_v22, %v308_v21  ;;  %v120_v24 = vpop.f32.mrb[1].mxu0 }
  0xe1   :  { %v121_v25 = vadd.f32 %v308_v21, %v120_v24 }
  0xe2   :  { %v130_v27 = vmax.f32 %v126_v23, 0.0 }
  0xe3   :  { %v129_v26 = vmax.f32 %v121_v25, 0.0 }
  0xe5   :  { %359 = vmatprep.mubr.msk.f32.mxu1 %vm141_vm1, %v129_v26 }
  0xe6   :  { %360 = vmatmul.mubr.msk.f32.vlgmr.msra.gmra.mrb[0].mxu1 %vm141_vm1, %v130_v27 }
 0x1b9   :  { %v361_v30 = vpop.f32.mrb[0].mxu1 }
 0x1ba   :  { %v224_v31 = vadd.f32 %v361_v30, %v132_v28  ;;  %v214_v32 = vpop.f32.mrb[1].mxu1 }
 0x1bb   :  { %v223_v33 = vadd.f32 %v214_v32, %v131_v29 }
 0x1bc   :  { %226 = vst.msk [vmem:[#allocation2 + $0x8] sm:$0xff] %vm31_vm0, %v224_v31 }
 0x1bd   :  { %225 = vst.msk [vmem:[#allocation2] sm:$0xff] %vm31_vm0, %v223_v33 }
 0x1c3   :  { %v231_v35 = vld [vmem:[#allocation2 + $0x8] sm:$0xff] }
 0x1c4   :  { %v230_v36 = vld [vmem:[#allocation2] sm:$0xff]  ;;  %v240_v38 = vadd.f32 %v313_v34, %v231_v35 }
 0x1c5   :  { %v239_v37 = vadd.f32 %v313_v34, %v230_v36 }
 0x1c6   :  { %v244_v41 = vadd.f32 %v240_v38, %v35_v16 }
 0x1c7   :  { %v243_v39 = vadd.f32 %v239_v37, %v34_v5 }
 0x1c8   :  { %v248_v42 = vsel %vm31_vm0, %v244_v41, 0.0 }
 0x1c9   :  { %v245_v40 = vsel %vm31_vm0, %v243_v39, 0.0 }
 0x1ca   :  { %246 = vadd.xlane.f32.xlu0 %v245_v40 }
 0x1ce   :  { %249 = vadd.xlane.f32.xlu0 %v248_v42 }
 0x257   :  { %v247_v43 = vpop.xlane.xlu0 %246 }
 0x258   :  { %v252_v44 = vmul.f32 0.03125, %v247_v43 }
 0x25a   :  { %v254_v45 = vsub.f32 %v243_v39, %v252_v44 }
 0x25b   :  { %v250_v46 = vpop.xlane.xlu0 %249 }
 0x25c   :  { %v253_v47 = vmul.f32 0.03125, %v250_v46  ;;  %v256_v48 = vmul.f32 %v254_v45, %v254_v45 }
 0x25e   :  { %v255_v49 = vsub.f32 %v244_v41, %v253_v47  ;;  %v258_v50 = vsel %vm31_vm0, %v256_v48, 0.0 }
 0x25f   :  { %259 = vadd.xlane.f32.xlu1 %v258_v50 }
 0x260   :  { %v257_v51 = vmul.f32 %v255_v49, %v255_v49 }
 0x262   :  { %v261_v52 = vsel %vm31_vm0, %v257_v51, 0.0 }
 0x263   :  { %262 = vadd.xlane.f32.xlu1 %v261_v52 }
 0x2ec   :  { %v260_v53 = vpop.xlane.xlu1 %259 }
 0x2ed   :  { %v264_v54 = vmul.f32 0.03125, %v260_v53 }
 0x2ef   :  { %v266_v55 = vadd.f32 1e-05, %v264_v54 }
 0x2f0   :  { %v263_v56 = vpop.xlane.xlu1 %262 }
 0x2f1   :  { %390 = vrsqrt.f32 %v266_v55  ;;  %v265_v57 = vmul.f32 0.03125, %v263_v56 }
 0x2f3   :  { %v267_v58 = vadd.f32 1e-05, %v265_v57 }
 0x2f5   :  { %392 = vrsqrt.f32 %v267_v58 }
 0x2fb   :  { %v391_v59 = vpop.eup %390 }
 0x2fc   :  { %v270_v61 = vmul.f32 %v391_v59, %v254_v45 }
 0x2fe   :  { %v279_v63 = vmul.f32 %v314_v60, %v270_v61 }
 0x2ff   :  { %v393_v0 = vpop.eup %392 }
 0x300   :  { %v271_v1 = vmul.f32 %v393_v0, %v255_v49  ;;  %v288_v2 = vadd.f32 %v315_v62, %v279_v63 }
 0x302   :  { %v280_v3 = vmul.f32 %v314_v60, %v271_v1  ;;  %290 = vst.msk [vmem:[#allocation3] sm:$0xff] %vm31_vm0, %v288_v2 }
 0x304   :  { %v289_v4 = vadd.f32 %v315_v62, %v280_v3 }
 0x306   :  { %291 = vst.msk [vmem:[#allocation3 + $0x8] sm:$0xff] %vm31_vm0, %v289_v4 }
 0x307   :  { %405 = shalt.err (!%p402_p4)
}
 0x308   :  { %s406_s12 = scalar_lea.hbm %s547_s7, 256 }
 0x309   :  { %p407_p5 = scmp.ne.s32.totalorder %s547_s7, %s406_s12  ;;  %p410_p6 = scmp.lt.u32.totalorder %s406_s12, %s547_s7 }
 0x30b   :  { %p412_p7 = pnand %p410_p6, %p407_p5 }
 0x30d   :  { %415 = shalt.err (!%p412_p7)
}
 0x30e   :  { %s420_s1 = smov 128   ;;  %s421_s17 = smov 8  }
 0x30f   :  { %303 = dma.vmem_to_hbm [thread:$0]  %s298_s10, 256, %s547_s7, [#allocation4], %s420_s1, %s420_s1, %s421_s17  }
 0x310   :  { %416 = dma.done.wait [#allocation4], 256  }
 0x311   :  { %417 = vsyncadd [#allocation4], 4294967040 }
 0x312   :  { %307 = vsyncpa [#allocation4], 1 }

</bundles_post_ra>
